<compile_context>
chip_gen: v7x
topology: tpu7x:2x2x1
jax: 0.10.0
libtpu: 0.0.40
codegen_flags: <defaults>
</compile_context>

<pallas_src>
import jax
import jax.numpy as jnp
from jax.experimental import pallas as pl
from jax.experimental.pallas import tpu as pltpu


# ----------------------------- Pallas kernel ---------------------------------

def _controller_kernel(text_ref, audio_ref, mask_ref,        # (B*St,Din) (B*La,Din) (B*St,1)
                       wenc_ref, benc_ref,                    # (2,Din,D) (2,1,D)   stub encoders
                       wblk_ref, bblk_ref,                    # (2O,St+La) (2O,1)   time projs
                       woutT_ref, bout_ref,                   # (D,O) (1,O)         out_net
                       temb_ref, aemb_ref, fused_ref,         # (B*St,D) (B*La,D) (B,O,O)
                       stack_ref):                            # VMEM scratch (St+La, D)
    f32 = jnp.float32
    neg = jnp.float32(0.01)                                   # F.leaky_relu default slope

    B, O, K = fused_ref.shape
    St = temb_ref.shape[0] // B
    La = aemb_ref.shape[0] // B

    # --- stub encoder linears, all batches folded into the matmul M dim -------
    temb = jnp.dot(text_ref[...], wenc_ref[0],
                   preferred_element_type=f32) + benc_ref[0]              # (B*St, D)
    aemb = jnp.dot(audio_ref[...], wenc_ref[1],
                   preferred_element_type=f32) + benc_ref[1]              # (B*La, D)
    temb_ref[...] = temb          # unmasked encoder outputs are module outputs too
    aemb_ref[...] = aemb

    # text masking (mask broadcast over the lane/feature dim)
    tmask = temb * mask_ref[...]                                          # (B*St, D)

    # --- per-batch: block-diag time projection + leaky_relu + add + out_net ---
    # Static unroll over B; every slice below is (8,128)-tile aligned (St, La, O
    # are multiples of 8), so no relayouts are generated.
    for b in range(B):
        stack_ref[0:St, :] = tmask[b * St:(b + 1) * St, :]
        stack_ref[St:St + La, :] = aemb[b * La:(b + 1) * La, :]

        # one (2O, St+La) @ (St+La, D) MXU call = both time projections
        ta = jnp.dot(wblk_ref[...], stack_ref[...],
                     preferred_element_type=f32) + bblk_ref[...]          # (2O, D)
        ta = jnp.where(ta >= 0, ta, neg * ta)                             # leaky_relu
        control = ta[:O, :] + ta[O:, :]                                   # (O, D)

        # out_net: (O, D) @ (D, K)
        fused_ref[b] = jnp.dot(control, woutT_ref[...],
                               preferred_element_type=f32) + bout_ref[...]


# ----------------------------- kernel wrapper ---------------------------------

def text_audio_controller_fused(text, audio, text_mask, params):
    """Fused 'spk-ta' path: stub encoders + masking + time projections +
    leaky_relu + add + out_net, in a single pallas_call.

    text      : (B, St, Din) raw text features, St <= text_max_length
    audio     : (B, La, Din) raw audio features, La == audio_max_length
    text_mask : (B, St) bool, True = keep (already-inverted padding mask)
    returns   : text_emb (B,St,D), audio_emb (B,La,D), ta_fused (B,O,K), all f32
    """
    B, St, Din = text.shape
    Ba, La, Dina = audio.shape
    D = params['enc_t_w'].shape[0]
    O, Lt = params['w_tt'].shape
    K = params['w_out'].shape[0]
    assert Ba == B and Dina == Din
    assert St <= Lt, "text sequence longer than text_max_length"
    assert params['w_at'].shape[1] == La, "audio length must equal audio_max_length"
    assert K == O == D, "out_net requires embedding dim == out_dim"

    f32 = jnp.float32
    # Free, contiguous reshapes — no transposes on the activation path.
    text2d = text.reshape(B * St, Din).astype(f32)
    audio2d = audio.reshape(B * La, Din).astype(f32)
    mask2d = text_mask.astype(f32).reshape(B * St, 1)

    # Parameter-only packing (done once per weight set in practice).
    wenc = jnp.stack([params['enc_t_w'].T, params['enc_a_w'].T]).astype(f32)     # (2, Din, D)
    benc = jnp.stack([params['enc_t_b'].reshape(1, D),
                      params['enc_a_b'].reshape(1, D)]).astype(f32)              # (2, 1, D)
    # Block-diagonal time-projection weight; the zero-pad up to text_max_length
    # is implicit (padded time columns of w_tt multiply zeros, so we drop them).
    wblk = jnp.zeros((2 * O, St + La), f32)
    wblk = wblk.at[:O, :St].set(params['w_tt'][:, :St].astype(f32))
    wblk = wblk.at[O:, St:].set(params['w_at'].astype(f32))
    bblk = jnp.concatenate([params['b_tt'], params['b_at']]).reshape(2 * O, 1).astype(f32)
    woutT = params['w_out'].T.astype(f32)                                        # (D, K)
    bout = params['b_out'].reshape(1, K).astype(f32)

    flops = (2 * B * Din * D * (St + La)            # stub encoders
             + 2 * B * (2 * O) * (St + La) * D      # time projections
             + 2 * B * O * D * K)                   # out_net
    bytes_accessed = 4 * (text2d.size + audio2d.size + mask2d.size + wenc.size
                          + benc.size + wblk.size + bblk.size + woutT.size + bout.size
                          + B * St * D + B * La * D + B * O * K)

    vmem = pl.BlockSpec(memory_space=pltpu.MemorySpace.VMEM)
    temb2d, aemb2d, fused = pl.pallas_call(
        _controller_kernel,
        out_shape=(jax.ShapeDtypeStruct((B * St, D), f32),
                   jax.ShapeDtypeStruct((B * La, D), f32),
                   jax.ShapeDtypeStruct((B, O, K), f32)),
        in_specs=[vmem] * 9,
        out_specs=(vmem, vmem, vmem),
        scratch_shapes=[pltpu.VMEM((St + La, D), f32)],
        cost_estimate=pl.CostEstimate(flops=flops, transcendentals=0,
                                      bytes_accessed=bytes_accessed),
    )(text2d, audio2d, mask2d, wenc, benc, wblk, bblk, woutT, bout)

    # Free reshapes only — no transposes on the outputs.
    return temb2d.reshape(B, St, D), aemb2d.reshape(B, La, D), fused


# ------------------------------ forward glue -----------------------------------

def _linear(x, w, b):
    return jnp.einsum('...i,oi->...o', x, w) + b


def text_audio_controller_forward(params, text, audio, text_pad_mask,
                                  person_type='spk-ta'):
    """Mirrors TextAudioController.forward semantics.

    text          : (B, St, Din)
    audio         : (B, La, Din)   (La == audio_max_length)
    text_pad_mask : (B, St) bool, True = padding (as produced by the text encoder)
    """
    text_mask = jnp.logical_not(text_pad_mask)     # ~text_mask
    audio_mask = None
    token2word_map = None                          # TODO(synk): encoder-internal, unspecified

    if person_type != 'spk-ta':
        # non-fused path: plain-JAX stub encoders only
        text_emb = _linear(text, params['enc_t_w'], params['enc_t_b'])
        audio_emb = _linear(audio, params['enc_a_w'], params['enc_a_b'])
        return audio_emb, text_emb, audio_mask, text_mask, token2word_map, None

    assert text.shape[1] <= params['text_max_length']

    text_emb, audio_emb, ta_fused = text_audio_controller_fused(
        text, audio, text_mask, params)

    return audio_emb, text_emb, audio_mask, text_mask, token2word_map, ta_fused


# ------------------------------ pure-JAX reference ------------------------------

def _reference_forward(params, text, audio, text_pad_mask):
    """f32 PyTorch semantics (including the explicit F.pad)."""
    def lrelu(x):
        return jnp.where(x >= 0, x, 0.01 * x)

    text_emb = _linear(text, params['enc_t_w'], params['enc_t_b'])       # (B, St, D)
    audio_emb = _linear(audio, params['enc_a_w'], params['enc_a_b'])     # (B, La, D)
    text_mask = jnp.logical_not(text_pad_mask)
    text_masked = text_emb * text_mask.astype(text_emb.dtype)[..., None]

    B, St, D = text_masked.shape
    Lt = params['w_tt'].shape[1]
    text_padded = jnp.pad(text_masked, ((0, 0), (0, Lt - St), (0, 0)))   # (B, Lt, D)

    t = jnp.einsum('bld,ol->bod', text_padded, params['w_tt']) + params['b_tt'][None, :, None]
    t = lrelu(t)                                                         # (B, O, D)
    a = jnp.einsum('bld,ol->bod', audio_emb, params['w_at']) + params['b_at'][None, :, None]
    a = lrelu(a)                                                         # (B, O, D)
    control = t + a
    fused = jnp.einsum('bod,kd->bok', control, params['w_out']) + params['b_out']
    return text_emb, audio_emb, fused


# ------------------------------ main --------------------------------------------

if __name__ == "__main__":
    key = jax.random.PRNGKey(0)
    ks = jax.random.split(key, 12)

    B = 2               # batch
    Din = 24            # raw text / audio feature dim
    St = 8              # actual text sequence length
    Lt = 16             # text_encoder.text_max_length
    La = 16             # audio_encoder.audio_max_length (audio arrives at max len)
    D = 128             # embedding dim of stub encoders (== out_dim)
    O = 128             # out_dim

    scale = 0.05
    params = {
        'text_max_length': Lt,
        # stub encoders
        'enc_t_w': scale * jax.random.normal(ks[0], (D, Din), jnp.float32),
        'enc_t_b': scale * jax.random.normal(ks[1], (D,), jnp.float32),
        'enc_a_w': scale * jax.random.normal(ks[2], (D, Din), jnp.float32),
        'enc_a_b': scale * jax.random.normal(ks[3], (D,), jnp.float32),
        # text_time_proj = nn.Linear(text_max_length, out_dim)
        'w_tt': scale * jax.random.normal(ks[4], (O, Lt), jnp.float32),
        'b_tt': scale * jax.random.normal(ks[5], (O,), jnp.float32),
        # audio_time_proj = nn.Linear(audio_max_length, out_dim)
        'w_at': scale * jax.random.normal(ks[6], (O, La), jnp.float32),
        'b_at': scale * jax.random.normal(ks[7], (O,), jnp.float32),
        # out_net = nn.Linear(out_dim, out_dim)
        'w_out': scale * jax.random.normal(ks[8], (O, O), jnp.float32),
        'b_out': scale * jax.random.normal(ks[9], (O,), jnp.float32),
    }

    text = jax.random.normal(ks[10], (B, St, Din), jnp.float32)
    audio = jax.random.normal(ks[11], (B, La, Din), jnp.float32)
    # text encoder padding mask: True = padding token
    text_pad_mask = jnp.arange(St)[None, :] >= jnp.array([6, 8])[:, None]

    outs = text_audio_controller_forward(params, text, audio, text_pad_mask,
                                         person_type='spk-ta')
    audio_emb, text_emb, audio_mask, text_mask, token2word_map, ta_fused = outs
    ta_fused = jax.block_until_ready(ta_fused)

    ref_text_emb, ref_audio_emb, ref_fused = _reference_forward(
        params, text, audio, text_pad_mask)

    assert ta_fused.shape == (B, O, O)
    assert text_emb.shape == (B, St, D) and audio_emb.shape == (B, La, D)

    err_t = jnp.max(jnp.abs(text_emb - ref_text_emb))
    err_a = jnp.max(jnp.abs(audio_emb - ref_audio_emb))
    err_f = jnp.max(jnp.abs(ta_fused - ref_fused))
    assert jnp.allclose(text_emb, ref_text_emb, atol=2e-3, rtol=1e-2), \
        f"text_emb mismatch (max abs err {err_t})"
    assert jnp.allclose(audio_emb, ref_audio_emb, atol=2e-3, rtol=1e-2), \
        f"audio_emb mismatch (max abs err {err_a})"
    assert jnp.allclose(ta_fused, ref_fused, atol=2e-3, rtol=1e-2), \
        f"ta_fused mismatch (max abs err {err_f})"

    print("KERNEL_OK")
</pallas_src>

<mosaic_0001>
module attributes {stable_mosaic.version = 11 : i64} {
  func.func @_controller_kernel(%arg0: memref<16x24xf32, #tpu.memory_space<vmem>>, %arg1: memref<32x24xf32, #tpu.memory_space<vmem>>, %arg2: memref<16x1xf32, #tpu.memory_space<vmem>>, %arg3: memref<2x24x128xf32, #tpu.memory_space<vmem>>, %arg4: memref<2x1x128xf32, #tpu.memory_space<vmem>>, %arg5: memref<256x24xf32, #tpu.memory_space<vmem>>, %arg6: memref<256x1xf32, #tpu.memory_space<vmem>>, %arg7: memref<128x128xf32, #tpu.memory_space<vmem>>, %arg8: memref<1x128xf32, #tpu.memory_space<vmem>>, %arg9: memref<16x128xf32, #tpu.memory_space<vmem>>, %arg10: memref<32x128xf32, #tpu.memory_space<vmem>>, %arg11: memref<2x128x128xf32, #tpu.memory_space<vmem>>, %arg12: memref<24x128xf32, #tpu.memory_space<vmem>>) attributes {dimension_semantics = [], scalar_prefetch = 0 : i64, scratch_operands = 1 : i64, tpu.core_type = #tpu.core_type<tc>} {
    %c0 = arith.constant 0 : index
    %c0_0 = arith.constant 0 : index
    %0 = vector.load %arg0[%c0, %c0_0] : memref<16x24xf32, #tpu.memory_space<vmem>>, vector<16x24xf32>
    %c0_1 = arith.constant 0 : index
    %c0_2 = arith.constant 0 : index
    %c0_3 = arith.constant 0 : index
    %1 = vector.load %arg3[%c0_1, %c0_2, %c0_3] : memref<2x24x128xf32, #tpu.memory_space<vmem>>, vector<1x24x128xf32>
    %2 = vector.shape_cast %1 : vector<1x24x128xf32> to vector<24x128xf32>
    %cst = arith.constant dense<0.000000e+00> : vector<16x128xf32>
    %3 = tpu.matmul %0, %2, %cst {dimension_numbers = #tpu.dot_dimension_numbers<[1], [0], [0], [1], [0, 0, 1, 1], [], []>} : vector<16x24xf32>, vector<24x128xf32>, vector<16x128xf32> -> vector<16x128xf32>
    %c0_4 = arith.constant 0 : index
    %c0_5 = arith.constant 0 : index
    %c0_6 = arith.constant 0 : index
    %4 = vector.load %arg4[%c0_4, %c0_5, %c0_6] : memref<2x1x128xf32, #tpu.memory_space<vmem>>, vector<1x1x128xf32>
    %5 = vector.shape_cast %4 : vector<1x1x128xf32> to vector<1x128xf32>
    %6 = vector.broadcast %5 : vector<1x128xf32> to vector<16x128xf32>
    %7 = arith.addf %3, %6 : vector<16x128xf32>
    %c0_7 = arith.constant 0 : index
    %c0_8 = arith.constant 0 : index
    %8 = vector.load %arg1[%c0_7, %c0_8] : memref<32x24xf32, #tpu.memory_space<vmem>>, vector<32x24xf32>
    %c1 = arith.constant 1 : index
    %c0_9 = arith.constant 0 : index
    %c0_10 = arith.constant 0 : index
    %9 = vector.load %arg3[%c1, %c0_9, %c0_10] : memref<2x24x128xf32, #tpu.memory_space<vmem>>, vector<1x24x128xf32>
    %10 = vector.shape_cast %9 : vector<1x24x128xf32> to vector<24x128xf32>
    %cst_11 = arith.constant dense<0.000000e+00> : vector<32x128xf32>
    %11 = tpu.matmul %8, %10, %cst_11 {dimension_numbers = #tpu.dot_dimension_numbers<[1], [0], [0], [1], [0, 0, 1, 1], [], []>} : vector<32x24xf32>, vector<24x128xf32>, vector<32x128xf32> -> vector<32x128xf32>
    %c1_12 = arith.constant 1 : index
    %c0_13 = arith.constant 0 : index
    %c0_14 = arith.constant 0 : index
    %12 = vector.load %arg4[%c1_12, %c0_13, %c0_14] : memref<2x1x128xf32, #tpu.memory_space<vmem>>, vector<1x1x128xf32>
    %13 = vector.shape_cast %12 : vector<1x1x128xf32> to vector<1x128xf32>
    %14 = vector.broadcast %13 : vector<1x128xf32> to vector<32x128xf32>
    %15 = arith.addf %11, %14 : vector<32x128xf32>
    %c0_15 = arith.constant 0 : index
    %c0_16 = arith.constant 0 : index
    %16 = vector.load %arg9[%c0_15, %c0_16] : memref<16x128xf32, #tpu.memory_space<vmem>>, vector<16x128xf32>
    tpu.vector_store %arg9[%c0_15, %c0_16], %7 {strides = array<i32>} : memref<16x128xf32, #tpu.memory_space<vmem>>, vector<16x128xf32>,
    %c0_17 = arith.constant 0 : index
    %c0_18 = arith.constant 0 : index
    %17 = vector.load %arg10[%c0_17, %c0_18] : memref<32x128xf32, #tpu.memory_space<vmem>>, vector<32x128xf32>
    tpu.vector_store %arg10[%c0_17, %c0_18], %15 {strides = array<i32>} : memref<32x128xf32, #tpu.memory_space<vmem>>, vector<32x128xf32>,
    %c0_19 = arith.constant 0 : index
    %c0_20 = arith.constant 0 : index
    %18 = vector.load %arg2[%c0_19, %c0_20] : memref<16x1xf32, #tpu.memory_space<vmem>>, vector<16x1xf32>
    %19 = vector.broadcast %18 : vector<16x1xf32> to vector<16x128xf32>
    %20 = arith.mulf %7, %19 : vector<16x128xf32>
    %21 = vector.extract_strided_slice %20 {offsets = [0, 0], sizes = [8, 128], strides = [1, 1]} : vector<16x128xf32> to vector<8x128xf32>
    %c0_21 = arith.constant 0 : index
    %c0_22 = arith.constant 0 : index
    %22 = vector.load %arg12[%c0_21, %c0_22] : memref<24x128xf32, #tpu.memory_space<vmem>>, vector<8x128xf32>
    tpu.vector_store %arg12[%c0_21, %c0_22], %21 {strides = array<i32>} : memref<24x128xf32, #tpu.memory_space<vmem>>, vector<8x128xf32>,
    %23 = vector.extract_strided_slice %15 {offsets = [0, 0], sizes = [16, 128], strides = [1, 1]} : vector<32x128xf32> to vector<16x128xf32>
    %c8 = arith.constant 8 : index
    %c0_23 = arith.constant 0 : index
    %24 = vector.load %arg12[%c8, %c0_23] : memref<24x128xf32, #tpu.memory_space<vmem>>, vector<16x128xf32>
    tpu.vector_store %arg12[%c8, %c0_23], %23 {strides = array<i32>} : memref<24x128xf32, #tpu.memory_space<vmem>>, vector<16x128xf32>,
    %c0_24 = arith.constant 0 : index
    %c0_25 = arith.constant 0 : index
    %25 = vector.load %arg5[%c0_24, %c0_25] : memref<256x24xf32, #tpu.memory_space<vmem>>, vector<256x24xf32>
    %c0_26 = arith.constant 0 : index
    %c0_27 = arith.constant 0 : index
    %26 = vector.load %arg12[%c0_26, %c0_27] : memref<24x128xf32, #tpu.memory_space<vmem>>, vector<24x128xf32>
    %cst_28 = arith.constant dense<0.000000e+00> : vector<256x128xf32>
    %27 = tpu.matmul %25, %26, %cst_28 {dimension_numbers = #tpu.dot_dimension_numbers<[1], [0], [0], [1], [0, 0, 1, 1], [], []>} : vector<256x24xf32>, vector<24x128xf32>, vector<256x128xf32> -> vector<256x128xf32>
    %c0_29 = arith.constant 0 : index
    %c0_30 = arith.constant 0 : index
    %28 = vector.load %arg6[%c0_29, %c0_30] : memref<256x1xf32, #tpu.memory_space<vmem>>, vector<256x1xf32>
    %29 = vector.broadcast %28 : vector<256x1xf32> to vector<256x128xf32>
    %30 = arith.addf %27, %29 : vector<256x128xf32>
    %cst_31 = arith.constant 0.000000e+00 : f32
    %31 = vector.broadcast %cst_31 : f32 to vector<256x128xf32>
    %32 = arith.cmpf oge, %30, %31 : vector<256x128xf32>
    %cst_32 = arith.constant 0.00999999977 : f32
    %33 = vector.broadcast %cst_32 : f32 to vector<256x128xf32>
    %34 = arith.mulf %33, %30 : vector<256x128xf32>
    %35 = arith.select %32, %30, %34 : vector<256x128xi1>, vector<256x128xf32>
    %36 = vector.extract_strided_slice %35 {offsets = [0, 0], sizes = [128, 128], strides = [1, 1]} : vector<256x128xf32> to vector<128x128xf32>
    %37 = vector.extract_strided_slice %35 {offsets = [128, 0], sizes = [128, 128], strides = [1, 1]} : vector<256x128xf32> to vector<128x128xf32>
    %38 = arith.addf %36, %37 : vector<128x128xf32>
    %c0_33 = arith.constant 0 : index
    %c0_34 = arith.constant 0 : index
    %39 = vector.load %arg7[%c0_33, %c0_34] : memref<128x128xf32, #tpu.memory_space<vmem>>, vector<128x128xf32>
    %cst_35 = arith.constant dense<0.000000e+00> : vector<128x128xf32>
    %40 = tpu.matmul %38, %39, %cst_35 {dimension_numbers = #tpu.dot_dimension_numbers<[1], [0], [0], [1], [0, 0, 1, 1], [], []>} : vector<128x128xf32>, vector<128x128xf32>, vector<128x128xf32> -> vector<128x128xf32>
    %c0_36 = arith.constant 0 : index
    %c0_37 = arith.constant 0 : index
    %41 = vector.load %arg8[%c0_36, %c0_37] : memref<1x128xf32, #tpu.memory_space<vmem>>, vector<1x128xf32>
    %42 = vector.broadcast %41 : vector<1x128xf32> to vector<128x128xf32>
    %43 = arith.addf %40, %42 : vector<128x128xf32>
    %c0_38 = arith.constant 0 : index
    %c0_39 = arith.constant 0 : index
    %c0_40 = arith.constant 0 : index
    %44 = vector.load %arg11[%c0_38, %c0_39, %c0_40] : memref<2x128x128xf32, #tpu.memory_space<vmem>>, vector<1x128x128xf32>
    %45 = vector.shape_cast %44 : vector<1x128x128xf32> to vector<128x128xf32>
    %46 = vector.shape_cast %43 : vector<128x128xf32> to vector<1x128x128xf32>
    tpu.vector_store %arg11[%c0_38, %c0_39, %c0_40], %46 {strides = array<i32>} : memref<2x128x128xf32, #tpu.memory_space<vmem>>, vector<1x128x128xf32>,
    %47 = vector.extract_strided_slice %20 {offsets = [8, 0], sizes = [8, 128], strides = [1, 1]} : vector<16x128xf32> to vector<8x128xf32>
    %c0_41 = arith.constant 0 : index
    %c0_42 = arith.constant 0 : index
    %48 = vector.load %arg12[%c0_41, %c0_42] : memref<24x128xf32, #tpu.memory_space<vmem>>, vector<8x128xf32>
    tpu.vector_store %arg12[%c0_41, %c0_42], %47 {strides = array<i32>} : memref<24x128xf32, #tpu.memory_space<vmem>>, vector<8x128xf32>,
    %49 = vector.extract_strided_slice %15 {offsets = [16, 0], sizes = [16, 128], strides = [1, 1]} : vector<32x128xf32> to vector<16x128xf32>
    %c8_43 = arith.constant 8 : index
    %c0_44 = arith.constant 0 : index
    %50 = vector.load %arg12[%c8_43, %c0_44] : memref<24x128xf32, #tpu.memory_space<vmem>>, vector<16x128xf32>
    tpu.vector_store %arg12[%c8_43, %c0_44], %49 {strides = array<i32>} : memref<24x128xf32, #tpu.memory_space<vmem>>, vector<16x128xf32>,
    %c0_45 = arith.constant 0 : index
    %c0_46 = arith.constant 0 : index
    %51 = vector.load %arg5[%c0_45, %c0_46] : memref<256x24xf32, #tpu.memory_space<vmem>>, vector<256x24xf32>
    %c0_47 = arith.constant 0 : index
    %c0_48 = arith.constant 0 : index
    %52 = vector.load %arg12[%c0_47, %c0_48] : memref<24x128xf32, #tpu.memory_space<vmem>>, vector<24x128xf32>
    %cst_49 = arith.constant dense<0.000000e+00> : vector<256x128xf32>
    %53 = tpu.matmul %51, %52, %cst_49 {dimension_numbers = #tpu.dot_dimension_numbers<[1], [0], [0], [1], [0, 0, 1, 1], [], []>} : vector<256x24xf32>, vector<24x128xf32>, vector<256x128xf32> -> vector<256x128xf32>
    %c0_50 = arith.constant 0 : index
    %c0_51 = arith.constant 0 : index
    %54 = vector.load %arg6[%c0_50, %c0_51] : memref<256x1xf32, #tpu.memory_space<vmem>>, vector<256x1xf32>
    %55 = vector.broadcast %54 : vector<256x1xf32> to vector<256x128xf32>
    %56 = arith.addf %53, %55 : vector<256x128xf32>
    %cst_52 = arith.constant 0.000000e+00 : f32
    %57 = vector.broadcast %cst_52 : f32 to vector<256x128xf32>
    %58 = arith.cmpf oge, %56, %57 : vector<256x128xf32>
    %cst_53 = arith.constant 0.00999999977 : f32
    %59 = vector.broadcast %cst_53 : f32 to vector<256x128xf32>
    %60 = arith.mulf %59, %56 : vector<256x128xf32>
    %61 = arith.select %58, %56, %60 : vector<256x128xi1>, vector<256x128xf32>
    %62 = vector.extract_strided_slice %61 {offsets = [0, 0], sizes = [128, 128], strides = [1, 1]} : vector<256x128xf32> to vector<128x128xf32>
    %63 = vector.extract_strided_slice %61 {offsets = [128, 0], sizes = [128, 128], strides = [1, 1]} : vector<256x128xf32> to vector<128x128xf32>
    %64 = arith.addf %62, %63 : vector<128x128xf32>
    %c0_54 = arith.constant 0 : index
    %c0_55 = arith.constant 0 : index
    %65 = vector.load %arg7[%c0_54, %c0_55] : memref<128x128xf32, #tpu.memory_space<vmem>>, vector<128x128xf32>
    %cst_56 = arith.constant dense<0.000000e+00> : vector<128x128xf32>
    %66 = tpu.matmul %64, %65, %cst_56 {dimension_numbers = #tpu.dot_dimension_numbers<[1], [0], [0], [1], [0, 0, 1, 1], [], []>} : vector<128x128xf32>, vector<128x128xf32>, vector<128x128xf32> -> vector<128x128xf32>
    %c0_57 = arith.constant 0 : index
    %c0_58 = arith.constant 0 : index
    %67 = vector.load %arg8[%c0_57, %c0_58] : memref<1x128xf32, #tpu.memory_space<vmem>>, vector<1x128xf32>
    %68 = vector.broadcast %67 : vector<1x128xf32> to vector<128x128xf32>
    %69 = arith.addf %66, %68 : vector<128x128xf32>
    %c1_59 = arith.constant 1 : index
    %c0_60 = arith.constant 0 : index
    %c0_61 = arith.constant 0 : index
    %70 = vector.load %arg11[%c1_59, %c0_60, %c0_61] : memref<2x128x128xf32, #tpu.memory_space<vmem>>, vector<1x128x128xf32>
    %71 = vector.shape_cast %70 : vector<1x128x128xf32> to vector<128x128xf32>
    %72 = vector.shape_cast %69 : vector<128x128xf32> to vector<1x128x128xf32>
    tpu.vector_store %arg11[%c1_59, %c0_60, %c0_61], %72 {strides = array<i32>} : memref<2x128x128xf32, #tpu.memory_space<vmem>>, vector<1x128x128xf32>,
    return
  }
}

</mosaic_0001>

<bundles_post_ra>
// kernel: tpu_custom_call.1
= control target key start
LH: loop header
LB: loop body
LE: loop exit
PB: predicated region body
PF: predicated region fallthrough
CT: control target
= control target key end

     0   :  { %17 = vsyncpa [#allocation4], 0  ;;  %vm49_vm0 = vcmask 195584   ;;  %v2629_v3 = vmov 0   ;;  %s3651_s0 = inlined_call_operand.vmem [shape: f32[16,24], index: 0, kind: input, shape index: {}]   ;;  %s3652_s1 = inlined_call_operand.vmem [shape: f32[32,24], index: 1, kind: input, shape index: {}]   ;;  %s3653_s2 = inlined_call_operand.vmem [shape: f32[16,1], index: 2, kind: input, shape index: {}]   ;;  %s3654_s3 = inlined_call_operand.vmem [shape: f32[2,24,128], index: 3, kind: input, shape index: {}]   ;;  %s3655_s4 = inlined_call_operand.vmem [shape: f32[2,1,128], index: 4, kind: input, shape index: {}]   ;;  %s3656_s5 = inlined_call_operand.vmem [shape: f32[256,24], index: 5, kind: input, shape index: {}]   ;;  %s3657_s6 = inlined_call_operand.vmem [shape: f32[256,1], index: 6, kind: input, shape index: {}]   ;;  %s3658_s7 = inlined_call_operand.vmem [shape: f32[128,128], index: 7, kind: input, shape index: {}]   ;;  %s3659_s8 = inlined_call_operand.vmem [shape: f32[1,128], index: 8, kind: input, shape index: {}]   ;;  %s3660_s9 = inlined_call_operand.hbm [shape: f32[16,128], index: 9, kind: output, shape index: {0}]   ;;  %s3661_s10 = inlined_call_operand.hbm [shape: f32[32,128], index: 10, kind: output, shape index: {1}]   ;;  %s3662_s11 = inlined_call_operand.hbm [shape: f32[2,128,128], index: 11, kind: output, shape index: {2}]  }
   0x1   :  { %v250_v0 = vld [vmem:[%s3653_s2] sm:$0xff]  ;;  %v40_v2 = vld [vmem:[%s3654_s3 + $0x8] sm:$0xff]  ;;  %2557 = vset.pattern.permute.xlu0 %v2629_v3  ;;  %2558 = vset.pattern.permute.xlu1 %v2629_v3  ;;  %v41_v6 = vld [vmem:[%s3654_s3 + $0x10] sm:$0xff] }
   0x2   :  { %v39_v1 = vld [vmem:[%s3654_s3] sm:$0xff]  ;;  %254 = vperm.xlu0 %2557, %v250_v0   ;;  %v2009_v7 = vld [vmem:[%s3654_s3 + $0x18] sm:$0xff]  ;;  %v38_v11 = vld [vmem:[%s3651_s0 + $0x8] sm:$0xff] }
   0x3   :  { %v2471_v4 = vpack.c.bf16 %v40_v2, %v39_v1  ;;  %v37_v5 = vld [vmem:[%s3651_s0] sm:$0xff]  ;;  %v2734_v13 = vld [vmem:[%s3657_s6 + $0x88] sm:$0xff]  ;;  %v2753_v17 = vld [vmem:[%s3657_s6 + $0x90] sm:$0xff] }
   0x4   :  { %2236 = vmatprep.mubr.msk.f32.mxu0 %vm49_vm0, %v37_v5  ;;  %v2010_v8 = vld [vmem:[%s3654_s3 + $0x20] sm:$0xff]  ;;  %v2011_v14 = vld [vmem:[%s3654_s3 + $0x28] sm:$0xff]  ;;  %v133_v19 = vld [vmem:[%s3652_s1 + $0x10] sm:$0xff] }
   0x5   :  { %2472 = vmatprep.subr.bf16.mxu0 %v2471_v4  ;;  %v2720_v9 = vld [vmem:[%s3657_s6] sm:$0xff]  ;;  %v2475_v10 = vpack.c.bf16 %v2010_v8, %v2009_v7  ;;  %v2747_v16 = vld [vmem:[%s3657_s6 + $0x8] sm:$0xff]  ;;  %v2766_v20 = vld [vmem:[%s3657_s6 + $0x10] sm:$0xff] }
   0x6   :  { %2474 = vmatpush3.bf16.msra.mxu0 %v2471_v4  ;;  %336 = vperm.xlu0 %2557, %v2720_v9   ;;  %v2729_v12 = vld [vmem:[%s3657_s6 + $0x80] sm:$0xff]  ;;  %v132_v18 = vld [vmem:[%s3652_s1 + $0x8] sm:$0xff]  ;;  %v2773_v21 = vld [vmem:[%s3657_s6 + $0x98] sm:$0xff] }
   0x7   :  { %2234 = vmatprep.subr.mxu0 %v41_v6  ;;  %416 = vperm.xlu1 %2558, %v2729_v12   ;;  %v131_v15 = vld [vmem:[%s3652_s1] sm:$0xff] }
   0xa   :  { %2235 = vmatpush3.msra.mxu0 %v41_v6  ;;  %421 = vperm.xlu0 %2557, %v2734_v13  }
   0xb   :  { %2237 = vmatmul.mubr.msk.f32.vlgmr.msra.gmra.mrb[0].mxu0 %vm49_vm0, %v38_v11  ;;  %2476 = vmatprep.subr.bf16.mxu0 %v2475_v10 }
   0xc   :  { %2478 = vmatpush3.bf16.msra.mxu0 %v2475_v10  ;;  %2245 = vmatprep.mubr.msk.f32.mxu0 %vm49_vm0, %v131_v15 }
   0xd   :  { %2243 = vmatprep.subr.mxu0 %v2011_v14  ;;  %341 = vperm.xlu1 %2558, %v2747_v16  }
   0xe   :  { %426 = vperm.xlu0 %2557, %v2753_v17  }
  0x10   :  { %2244 = vmatpush3.msra.mxu0 %v2011_v14 }
  0x11   :  { %2246 = vmatmul.mubr.msk.f32.vlgmr.msra.gmra.mrb[2].mxu0 %vm49_vm0, %v132_v18 }
  0x12   :  { %18 = vsyncpa [#allocation6], 0  ;;  %2248 = vmatprep.mubr.msk.f32.mxu0 %vm49_vm0, %v133_v19  ;;  %v134_v22 = vld [vmem:[%s3652_s1 + $0x18] sm:$0xff]  ;;  %346 = vperm.xlu1 %2558, %v2766_v20   ;;  %v2790_v24 = vld [vmem:[%s3657_s6 + $0xa0] sm:$0xff]  ;;  %s2631_s1 = smov [#allocation3]  }
  0x13   :  { %v2783_v23 = vld [vmem:[%s3657_s6 + $0x18] sm:$0xff]  ;;  %431 = vperm.xlu0 %2557, %v2773_v21   ;;  %v2796_v25 = vld [vmem:[%s3657_s6 + $0x20] sm:$0xff]  ;;  %v2802_v26 = vld [vmem:[%s3657_s6 + $0xa8] sm:$0xff]  ;;  %s1964_s22 = sshll.u32 %s2631_s1, 4  ;;  %s1965_s22 = int_to_ptr.vmem [resolvable:$true] %s1964_s22 }
  0x14   :  { %v2808_v27 = vld [vmem:[%s3657_s6 + $0x28] sm:$0xff]  ;;  %v2814_v28 = vld [vmem:[%s3657_s6 + $0xb0] sm:$0xff]  ;;  %v2826_v30 = vld [vmem:[%s3657_s6 + $0xb8] sm:$0xff] }
  0x15   :  { %2249 = vmatmul.mubr.msk.f32.gmra.mrb[4].mxu0 %vm49_vm0, %v134_v22  ;;  %v2820_v29 = vld [vmem:[%s3657_s6 + $0x30] sm:$0xff]  ;;  %v2832_v31 = vld [vmem:[%s3657_s6 + $0x38] sm:$0xff]  ;;  %v2838_v32 = vld [vmem:[%s3657_s6 + $0xc0] sm:$0xff] }
  0x16   :  { %351 = vperm.xlu1 %2558, %v2783_v23   ;;  %v2844_v33 = vld [vmem:[%s3657_s6 + $0x40] sm:$0xff]  ;;  %v2850_v34 = vld [vmem:[%s3657_s6 + $0xc8] sm:$0xff]  ;;  %v2862_v36 = vld [vmem:[%s3657_s6 + $0xd0] sm:$0xff] }
  0x17   :  { %436 = vperm.xlu0 %2557, %v2790_v24   ;;  %v2856_v35 = vld [vmem:[%s3657_s6 + $0x48] sm:$0xff]  ;;  %v2868_v37 = vld [vmem:[%s3657_s6 + $0x50] sm:$0xff]  ;;  %v2874_v38 = vld [vmem:[%s3657_s6 + $0xd8] sm:$0xff] }
  0x18   :  { %v2880_v39 = vld [vmem:[%s3657_s6 + $0x58] sm:$0xff]  ;;  %v2886_v40 = vld [vmem:[%s3657_s6 + $0xe0] sm:$0xff]  ;;  %v2898_v42 = vld [vmem:[%s3657_s6 + $0xe8] sm:$0xff] }
  0x19   :  { %v2892_v41 = vld [vmem:[%s3657_s6 + $0x60] sm:$0xff]  ;;  %v2904_v43 = vld [vmem:[%s3657_s6 + $0x68] sm:$0xff]  ;;  %v2910_v44 = vld [vmem:[%s3657_s6 + $0xf0] sm:$0xff] }
  0x1a   :  { %356 = vperm.xlu1 %2558, %v2796_v25   ;;  %v2916_v45 = vld [vmem:[%s3657_s6 + $0x70] sm:$0xff]  ;;  %v2922_v46 = vld [vmem:[%s3657_s6 + $0xf8] sm:$0xff]  ;;  %v251_v48 = vld [vmem:[%s3653_s2 + $0x8] sm:$0xff] }
  0x1b   :  { %441 = vperm.xlu0 %2557, %v2802_v26   ;;  %v2928_v47 = vld [vmem:[%s3657_s6 + $0x78] sm:$0xff]  ;;  %v927_v49 = vld [vmem:[%s3658_s7] sm:$0xff]  ;;  %v928_v50 = vld [vmem:[%s3658_s7 + $0x8] sm:$0xff] }
  0x1c   :  { %v2943_v51 = vpack.c.bf16 %v928_v50, %v927_v49  ;;  %v929_v52 = vld [vmem:[%s3658_s7 + $0x10] sm:$0xff]  ;;  %v930_v53 = vld [vmem:[%s3658_s7 + $0x18] sm:$0xff]  ;;  %v931_v55 = vld [vmem:[%s3658_s7 + $0x20] sm:$0xff] }
  0x1d   :  { %v2955_v54 = vpack.c.bf16 %v930_v53, %v929_v52  ;;  %v932_v56 = vld [vmem:[%s3658_s7 + $0x28] sm:$0xff]  ;;  %v933_v58 = vld [vmem:[%s3658_s7 + $0x30] sm:$0xff]  ;;  %v934_v59 = vld [vmem:[%s3658_s7 + $0x38] sm:$0xff] }
  0x1e   :  { %361 = vperm.xlu1 %2558, %v2808_v27   ;;  %2484 = vmatprep.subr.bf16.mxu1 %v2943_v51  ;;  %v2967_v57 = vpack.c.bf16 %v932_v56, %v931_v55  ;;  %v2495_v60 = vpack.c.bf16 %v934_v59, %v933_v58  ;;  %v935_v61 = vld [vmem:[%s3658_s7 + $0x40] sm:$0xff]  ;;  %v936_v62 = vld [vmem:[%s3658_s7 + $0x48] sm:$0xff]  ;;  %v937_v0 = vld [vmem:[%s3658_s7 + $0x50] sm:$0xff] }
  0x1f   :  { %446 = vperm.xlu0 %2557, %v2814_v28   ;;  %2486 = vmatpush3.bf16.msra.mxu1 %v2943_v51  ;;  %v2499_v63 = vpack.c.bf16 %v936_v62, %v935_v61  ;;  %v938_v1 = vld [vmem:[%s3658_s7 + $0x58] sm:$0xff]  ;;  %v939_v3 = vld [vmem:[%s3658_s7 + $0x60] sm:$0xff]  ;;  %v940_v4 = vld [vmem:[%s3658_s7 + $0x68] sm:$0xff] }
  0x20   :  { %2488 = vmatprep.subr.bf16.mxu1 %v2955_v54  ;;  %v2503_v2 = vpack.c.bf16 %v938_v1, %v937_v0  ;;  %v2507_v5 = vpack.c.bf16 %v940_v4, %v939_v3  ;;  %v941_v6 = vld [vmem:[%s3658_s7 + $0x70] sm:$0xff]  ;;  %v942_v7 = vld [vmem:[%s3658_s7 + $0x78] sm:$0xff]  ;;  %v3102_v49 = vld [vmem:[%s3656_s5 + $0x20] sm:$0xff] }
  0x21   :  { %v2511_v8 = vpack.c.bf16 %v942_v7, %v941_v6  ;;  %v3112_v50 = vld [vmem:[%s3656_s5 + $0x28] sm:$0xff]  ;;  %v3128_v52 = vld [vmem:[%s3656_s5 + $0x38] sm:$0xff]  ;;  %v3134_v53 = vld [vmem:[%s3656_s5 + $0x40] sm:$0xff] }
  0x22   :  { %366 = vperm.xlu1 %2558, %v2820_v29   ;;  %3690 = vst [vmem:[#allocation11_spill] sm:$0xff] %v3128_v52  ;;  %3691 = vst [vmem:[#allocation12_spill] sm:$0xff] %v3134_v53  ;;  %v3148_v55 = vld [vmem:[%s3656_s5 + $0x50] sm:$0xff]  ;;  %v3157_v56 = vld [vmem:[%s3656_s5 + $0x58] sm:$0xff] }
  0x23   :  { %451 = vperm.xlu0 %2557, %v2826_v30   ;;  %2490 = vmatpush3.bf16.msra.mxu1 %v2955_v54  ;;  %3693 = vst [vmem:[#allocation14_spill] sm:$0xff] %v3148_v55  ;;  %3694 = vst [vmem:[#allocation15_spill] sm:$0xff] %v3157_v56  ;;  %v3171_v58 = vld [vmem:[%s3656_s5 + $0x68] sm:$0xff]  ;;  %v3176_v59 = vld [vmem:[%s3656_s5 + $0x70] sm:$0xff] }
  0x24   :  { %2492 = vmatprep.subr.bf16.mxu1 %v2967_v57  ;;  %3696 = vst [vmem:[#allocation17_spill] sm:$0xff] %v3171_v58  ;;  %3697 = vst [vmem:[#allocation18_spill] sm:$0xff] %v3176_v59  ;;  %v3190_v61 = vld [vmem:[%s3656_s5 + $0x80] sm:$0xff]  ;;  %v3199_v62 = vld [vmem:[%s3656_s5 + $0x88] sm:$0xff] }
  0x25   :  { %3699 = vst [vmem:[#allocation20_spill] sm:$0xff] %v3190_v61  ;;  %3700 = vst [vmem:[#allocation21_spill] sm:$0xff] %v3199_v62  ;;  %v3213_v0 = vld [vmem:[%s3656_s5 + $0x98] sm:$0xff]  ;;  %v3218_v1 = vld [vmem:[%s3656_s5 + $0xa0] sm:$0xff] }
  0x26   :  { %371 = vperm.xlu1 %2558, %v2832_v31   ;;  %3702 = vst [vmem:[#allocation23_spill] sm:$0xff] %v3213_v0  ;;  %3703 = vst [vmem:[#allocation24_spill] sm:$0xff] %v3218_v1  ;;  %v3232_v3 = vld [vmem:[%s3656_s5 + $0xb0] sm:$0xff]  ;;  %v3241_v4 = vld [vmem:[%s3656_s5 + $0xb8] sm:$0xff] }
  0x27   :  { %456 = vperm.xlu0 %2557, %v2838_v32   ;;  %2494 = vmatpush3.bf16.msra.mxu1 %v2967_v57  ;;  %3705 = vst [vmem:[#allocation26_spill] sm:$0xff] %v3232_v3  ;;  %3706 = vst [vmem:[#allocation27_spill] sm:$0xff] %v3241_v4  ;;  %v3255_v6 = vld [vmem:[%s3656_s5 + $0xc8] sm:$0xff]  ;;  %v3260_v7 = vld [vmem:[%s3656_s5 + $0xd0] sm:$0xff] }
  0x28   :  { %2496 = vmatprep.subr.bf16.mxu1 %v2495_v60  ;;  %3708 = vst [vmem:[#allocation29_spill] sm:$0xff] %v3255_v6  ;;  %3709 = vst [vmem:[#allocation30_spill] sm:$0xff] %v3260_v7 }
  0x2a   :  { %376 = vperm.xlu1 %2558, %v2844_v33  }
  0x2b   :  { %461 = vperm.xlu0 %2557, %v2850_v34   ;;  %2498 = vmatpush3.bf16.msra.mxu1 %v2495_v60  ;;  %v3185_v60 = vld [vmem:[%s3656_s5 + $0x78] sm:$0xff] }
  0x2c   :  { %2500 = vmatprep.subr.bf16.mxu1 %v2499_v63  ;;  %3698 = vst [vmem:[#allocation19_spill] sm:$0xff] %v3185_v60 }
  0x2e   :  { %381 = vperm.xlu1 %2558, %v2856_v35  }
  0x2f   :  { %466 = vperm.xlu0 %2557, %v2862_v36   ;;  %2502 = vmatpush3.bf16.msra.mxu1 %v2499_v63  ;;  %v3204_v63 = vld [vmem:[%s3656_s5 + $0x90] sm:$0xff] }
  0x30   :  { %2504 = vmatprep.subr.bf16.mxu1 %v2503_v2  ;;  %3701 = vst [vmem:[#allocation22_spill] sm:$0xff] %v3204_v63 }
  0x32   :  { %386 = vperm.xlu1 %2558, %v2868_v37  }
  0x33   :  { %471 = vperm.xlu0 %2557, %v2874_v38   ;;  %2506 = vmatpush3.bf16.msra.mxu1 %v2503_v2  ;;  %v3227_v2 = vld [vmem:[%s3656_s5 + $0xa8] sm:$0xff] }
  0x34   :  { %2508 = vmatprep.subr.bf16.mxu1 %v2507_v5  ;;  %3704 = vst [vmem:[#allocation25_spill] sm:$0xff] %v3227_v2 }
  0x36   :  { %391 = vperm.xlu1 %2558, %v2880_v39  }
  0x37   :  { %476 = vperm.xlu0 %2557, %v2886_v40   ;;  %2510 = vmatpush3.bf16.msra.mxu1 %v2507_v5  ;;  %v3246_v5 = vld [vmem:[%s3656_s5 + $0xc0] sm:$0xff] }
  0x38   :  { %2512 = vmatprep.subr.bf16.mxu1 %v2511_v8  ;;  %3707 = vst [vmem:[#allocation28_spill] sm:$0xff] %v3246_v5 }
  0x3a   :  { %396 = vperm.xlu1 %2558, %v2892_v41  }
  0x3b   :  { %481 = vperm.xlu0 %2557, %v2898_v42   ;;  %2514 = vmatpush3.bf16.msra.mxu1 %v2511_v8  ;;  %v3269_v8 = vld [vmem:[%s3656_s5 + $0xd8] sm:$0xff] }
  0x3c   :  { %3710 = vst [vmem:[#allocation31_spill] sm:$0xff] %v3269_v8 }
  0x3e   :  { %401 = vperm.xlu1 %2558, %v2904_v43  }
  0x3f   :  { %486 = vperm.xlu0 %2557, %v2910_v44  }
  0x42   :  { %406 = vperm.xlu1 %2558, %v2916_v45  }
  0x43   :  { %491 = vperm.xlu0 %2557, %v2922_v46  }
  0x46   :  { %411 = vperm.xlu1 %2558, %v2928_v47  }
  0x47   :  { %1183 = vperm.xlu0 %2557, %v2720_v9   ;;  %v3016_v9 = vld [vmem:[%s3656_s5] sm:$0xff] }
  0x48   :  { %2257 = vmatprep.mubr.msk.f32.mxu0 %vm49_vm0, %v3016_v9 }
  0x4a   :  { %259 = vperm.xlu1 %2558, %v251_v48   ;;  %v3096_v48 = vld [vmem:[%s3656_s5 + $0x18] sm:$0xff] }
  0x4b   :  { %1188 = vperm.xlu0 %2557, %v2747_v16  }
  0x4e   :  { %1263 = vperm.xlu1 %2558, %v2729_v12  }
  0x4f   :  { %1193 = vperm.xlu0 %2557, %v2766_v20  }
  0x52   :  { %1268 = vperm.xlu1 %2558, %v2734_v13  }
  0x53   :  { %1198 = vperm.xlu0 %2557, %v2783_v23  }
  0x56   :  { %1273 = vperm.xlu1 %2558, %v2753_v17  }
  0x57   :  { %1203 = vperm.xlu0 %2557, %v2796_v25   ;;  %v2006_v25 = vld [vmem:[%s3655_s4] ss:$0 sm:$0xff] }
  0x5a   :  { %1278 = vperm.xlu1 %2558, %v2773_v21  }
  0x5b   :  { %1208 = vperm.xlu0 %2557, %v2808_v27  }
  0x5e   :  { %1283 = vperm.xlu1 %2558, %v2790_v24  }
  0x5f   :  { %1213 = vperm.xlu0 %2557, %v2820_v29  }
  0x62   :  { %1288 = vperm.xlu1 %2558, %v2802_v26  }
  0x63   :  { %1218 = vperm.xlu0 %2557, %v2832_v31   ;;  %v2013_v31 = vld [vmem:[%s3655_s4 + $0x1] ss:$0 sm:$0xff] }
  0x66   :  { %1293 = vperm.xlu1 %2558, %v2814_v28  }
  0x67   :  { %1223 = vperm.xlu0 %2557, %v2844_v33  }
  0x6a   :  { %1298 = vperm.xlu1 %2558, %v2826_v30  }
  0x6b   :  { %1228 = vperm.xlu0 %2557, %v2856_v35  }
  0x6e   :  { %1303 = vperm.xlu1 %2558, %v2838_v32  }
  0x6f   :  { %1233 = vperm.xlu0 %2557, %v2868_v37  }
  0x72   :  { %1308 = vperm.xlu1 %2558, %v2850_v34  }
  0x73   :  { %1238 = vperm.xlu0 %2557, %v2880_v39  }
  0x76   :  { %1313 = vperm.xlu1 %2558, %v2862_v36  }
  0x77   :  { %1243 = vperm.xlu0 %2557, %v2892_v41  }
  0x7a   :  { %1318 = vperm.xlu1 %2558, %v2874_v38  }
  0x7b   :  { %1248 = vperm.xlu0 %2557, %v2904_v43  }
  0x7e   :  { %1323 = vperm.xlu1 %2558, %v2886_v40  }
  0x7f   :  { %1253 = vperm.xlu0 %2557, %v2916_v45  }
  0x81   :  { %v255_v33 = vpop.permute.xlu0 %254 }
  0x82   :  { %1328 = vperm.xlu1 %2558, %v2898_v42  }
  0x83   :  { %1258 = vperm.xlu0 %2557, %v2928_v47   ;;  %v3086_v47 = vld [vmem:[%s3656_s5 + $0x10] sm:$0xff] }
  0x86   :  { %1333 = vperm.xlu1 %2558, %v2910_v44   ;;  %v3033_v10 = vpop.permute.xlu1 %416 }
  0x8a   :  { %1338 = vperm.xlu1 %2558, %v2922_v46   ;;  %v3080_v46 = vld [vmem:[%s3656_s5 + $0x8] sm:$0xff] }
  0x8c   :  { %v3036_v11 = vpop.permute.xlu1 %341 }
  0x91   :  { %v3038_v12 = vpop.permute.xlu1 %346 }
  0x95   :  { %v3040_v13 = vpop.permute.xlu1 %351 }
  0x99   :  { %v3042_v14 = vpop.permute.xlu1 %356 }
  0x9d   :  { %v3044_v15 = vpop.permute.xlu1 %361 }
  0xa1   :  { %v3046_v16 = vpop.permute.xlu1 %366 }
  0xa5   :  { %v3048_v17 = vpop.permute.xlu1 %371 }
  0xa9   :  { %v3050_v18 = vpop.permute.xlu1 %376 }
  0xad   :  { %v3052_v19 = vpop.permute.xlu1 %381 }
  0xb1   :  { %v3054_v20 = vpop.permute.xlu1 %386 }
  0xb5   :  { %v3056_v21 = vpop.permute.xlu1 %391 }
  0xb9   :  { %v3058_v22 = vpop.permute.xlu1 %396 }
  0xbd   :  { %v3060_v23 = vpop.permute.xlu1 %401 }
  0xc1   :  { %v3062_v24 = vpop.permute.xlu1 %406 }
  0xc5   :  { %v3067_v30 = vpop.permute.xlu1 %411 }
  0xc9   :  { %v260_v38 = vpop.permute.xlu1 %259 }
  0xde   :  { %v2238_v26 = vpop.f32.mrb[0].mxu0 }
  0xdf   :  { %v128_v27 = vadd.f32 %v2238_v26, %v2006_v25  ;;  %v122_v28 = vpop.f32.mrb[1].mxu0  ;;  %v3283_v26 = vld [vmem:[%s3656_s5 + $0xe8] sm:$0xff] }
  0xe0   :  { %v123_v29 = vadd.f32 %v2006_v25, %v122_v28  ;;  %v3274_v25 = vld [vmem:[%s3656_s5 + $0xe0] sm:$0xff]  ;;  %3712 = vst [vmem:[#allocation33_spill] sm:$0xff] %v3283_v26  ;;  %v3297_v28 = vld [vmem:[%s3656_s5 + $0xf8] sm:$0xff] }
  0xe1   :  { %245 = vst [vmem:[#allocation3 + $0x8] sm:$0xff] %v128_v27  ;;  %v263_v43 = vmul.f32 %v260_v38, %v128_v27  ;;  %3711 = vst [vmem:[#allocation32_spill] sm:$0xff] %v3274_v25  ;;  %v3288_v27 = vld [vmem:[%s3656_s5 + $0xf0] sm:$0xff] }
  0xe2   :  { %244 = vst [vmem:[#allocation3] sm:$0xff] %v123_v29  ;;  %v262_v36 = vmul.f32 %v255_v33, %v123_v29  ;;  %3713 = vst [vmem:[#allocation34_spill] sm:$0xff] %v3288_v27  ;;  %v337_v29 = vpop.permute.xlu0 %336 }
  0xe3   :  { %3714 = vst [vmem:[#allocation35_spill] sm:$0xff] %v3297_v28 }
  0xe4   :  { %v2247_v32 = vpop.f32.mrb[2].mxu0 }
  0xe5   :  { %v231_v34 = vadd.f32 %v2247_v32, %v2013_v31  ;;  %v225_v35 = vpop.f32.mrb[3].mxu0 }
  0xe6   :  { %v226_v37 = vadd.f32 %v2013_v31, %v225_v35 }
  0xe7   :  { %247 = vst [vmem:[#allocation5 + $0x8] sm:$0xff] %v231_v34 }
  0xe8   :  { %246 = vst [vmem:[#allocation5] sm:$0xff] %v226_v37  ;;  %v2479_v39 = vpack.c.bf16 %v226_v37, %v262_v36  ;;  %v2250_v40 = vpop.f32.mrb[4].mxu0 }
  0xe9   :  { %v3072_v41 = vadd.f32 %v2250_v40, %v2013_v31  ;;  %v235_v42 = vpop.f32.mrb[5].mxu0 }
  0xea   :  { %v236_v44 = vadd.f32 %v2013_v31, %v235_v42  ;;  %2480 = vmatprep.subr.bf16.mxu0 %v2479_v39  ;;  %v422_v31 = vpop.permute.xlu0 %421 }
  0xeb   :  { %249 = vst [vmem:[#allocation5 + $0x18] sm:$0xff] %v3072_v41  ;;  %2482 = vmatpush3.bf16.msra.mxu0 %v2479_v39 }
  0xec   :  { %248 = vst [vmem:[#allocation5 + $0x10] sm:$0xff] %v236_v44  ;;  %v3075_v45 = vpack.c.bf16 %v236_v44, %v263_v43  ;;  %2255 = vmatprep.subr.mxu0 %v231_v34 }
  0xee   :  { %2516 = vmatprep.subr.bf16.mxu1 %v3075_v45  ;;  %v3301_v32 = vpop.permute.xlu0 %426 }
  0xef   :  { %2256 = vmatpush3.msra.mxu0 %v231_v34 }
  0xf0   :  { %2258 = vmatmul.mubr.msk.f32.vlgmr.msra.gmra.mrb[6].mxu0 %vm49_vm0, %v3080_v46  ;;  %2520 = vmatprep.subr.bf16.mxu0 %v2943_v51 }
  0xf1   :  { %2260 = vmatprep.mubr.msk.f32.mxu0 %vm49_vm0, %v3086_v47  ;;  %2522 = vmatpush3.bf16.msra.mxu0 %v2943_v51  ;;  %v3118_v51 = vld [vmem:[%s3656_s5 + $0x30] sm:$0xff] }
  0xf2   :  { %2524 = vmatprep.subr.bf16.mxu0 %v2955_v54  ;;  %3689 = vst [vmem:[#allocation10_spill] sm:$0xff] %v3118_v51  ;;  %v432_v33 = vpop.permute.xlu0 %431 }
  0xf4   :  { %2261 = vmatmul.mubr.msk.f32.gmra.mrb[8].mxu0 %vm49_vm0, %v3096_v48 }
  0xf5   :  { %2263 = vmatprep.mubr.msk.f32.mxu0 %vm49_vm0, %v3102_v49  ;;  %2526 = vmatpush3.bf16.msra.mxu0 %v2955_v54  ;;  %v3143_v54 = vld [vmem:[%s3656_s5 + $0x48] sm:$0xff] }
  0xf6   :  { %2528 = vmatprep.subr.bf16.mxu0 %v2967_v57  ;;  %3692 = vst [vmem:[#allocation13_spill] sm:$0xff] %v3143_v54  ;;  %v3303_v34 = vpop.permute.xlu0 %436 }
  0xf8   :  { %2264 = vmatmul.mubr.msk.f32.gmra.mrb[10].mxu0 %vm49_vm0, %v3112_v50 }
  0xf9   :  { %2266 = vmatprep.mubr.msk.f32.mxu0 %vm49_vm0, %v3118_v51  ;;  %2530 = vmatpush3.bf16.msra.mxu0 %v2967_v57  ;;  %v3162_v57 = vld [vmem:[%s3656_s5 + $0x60] sm:$0xff] }
  0xfa   :  { %3695 = vst [vmem:[#allocation16_spill] sm:$0xff] %v3162_v57  ;;  %v3305_v35 = vpop.permute.xlu0 %441 }
  0xfc   :  { %2267 = vmatmul.mubr.msk.f32.gmra.mrb[12].mxu0 %vm49_vm0, %v3128_v52 }
  0xfd   :  { %2269 = vmatprep.mubr.msk.f32.mxu0 %vm49_vm0, %v3134_v53 }
  0xfe   :  { %v3307_v40 = vpop.permute.xlu0 %446 }
 0x100   :  { %2270 = vmatmul.mubr.msk.f32.gmra.mrb[14].mxu0 %vm49_vm0, %v3143_v54 }
 0x101   :  { %2272 = vmatprep.mubr.msk.f32.mxu0 %vm49_vm0, %v3148_v55 }
 0x102   :  { %v3309_v44 = vpop.permute.xlu0 %451 }
 0x104   :  { %2273 = vmatmul.mubr.msk.f32.gmra.mrb[16].mxu0 %vm49_vm0, %v3157_v56 }
 0x105   :  { %2275 = vmatprep.mubr.msk.f32.mxu0 %vm49_vm0, %v3162_v57 }
 0x108   :  { %2276 = vmatmul.mubr.msk.f32.gmra.mrb[18].mxu0 %vm49_vm0, %v3171_v58 }
 0x109   :  { %2278 = vmatprep.mubr.msk.f32.mxu0 %vm49_vm0, %v3176_v59 }
 0x10c   :  { %2279 = vmatmul.mubr.msk.f32.gmra.mrb[20].mxu0 %vm49_vm0, %v3185_v60 }
 0x10d   :  { %2281 = vmatprep.mubr.msk.f32.mxu0 %vm49_vm0, %v3190_v61 }
 0x110   :  { %2282 = vmatmul.mubr.msk.f32.gmra.mrb[22].mxu0 %vm49_vm0, %v3199_v62 }
 0x111   :  { %2284 = vmatprep.mubr.msk.f32.mxu0 %vm49_vm0, %v3204_v63 }
 0x114   :  { %2285 = vmatmul.mubr.msk.f32.gmra.mrb[24].mxu0 %vm49_vm0, %v3213_v0 }
 0x115   :  { %2287 = vmatprep.mubr.msk.f32.mxu0 %vm49_vm0, %v3218_v1 }
 0x118   :  { %2288 = vmatmul.mubr.msk.f32.gmra.mrb[26].mxu0 %vm49_vm0, %v3227_v2 }
 0x119   :  { %2290 = vmatprep.mubr.msk.f32.mxu0 %vm49_vm0, %v3232_v3 }
 0x11c   :  { %2291 = vmatmul.mubr.msk.f32.gmra.mrb[28].mxu0 %vm49_vm0, %v3241_v4 }
 0x11d   :  { %2293 = vmatprep.mubr.msk.f32.mxu0 %vm49_vm0, %v3246_v5 }
 0x120   :  { %2294 = vmatmul.mubr.msk.f32.gmra.mrb[30].mxu0 %vm49_vm0, %v3255_v6 }
 0x121   :  { %2296 = vmatprep.mubr.msk.f32.mxu0 %vm49_vm0, %v3260_v7 }
 0x124   :  { %2297 = vmatmul.mubr.msk.f32.gmra.mrb[32].mxu0 %vm49_vm0, %v3269_v8  ;;  %v3313_v8 = vpop.permute.xlu0 %456 }
 0x125   :  { %2299 = vmatprep.mubr.msk.f32.mxu0 %vm49_vm0, %v3274_v25 }
 0x128   :  { %2300 = vmatmul.mubr.msk.f32.gmra.mrb[34].mxu0 %vm49_vm0, %v3283_v26  ;;  %v3319_v5 = vpop.permute.xlu0 %461 }
 0x129   :  { %2302 = vmatprep.mubr.msk.f32.mxu0 %vm49_vm0, %v3288_v27 }
 0x12c   :  { %2303 = vmatmul.mubr.msk.f32.gmra.mrb[36].mxu0 %vm49_vm0, %v3297_v28  ;;  %v3333_v58 = vpop.permute.xlu0 %466 }
 0x130   :  { %v3338_v52 = vpop.permute.xlu0 %471 }
 0x1c3   :  { %v2259_v36 = vpop.f32.mrb[6].mxu0 }
 0x1c4   :  { %v656_v37 = vpop.f32.mrb[7].mxu0  ;;  %v662_v3 = vadd.f32 %v2259_v36, %v3036_v11 }
 0x1c5   :  { %v657_v1 = vadd.f32 %v656_v37, %v337_v29 }
 0x1c6   :  { %v848_v61 = vmul.f32 0.01, %v662_v3  ;;  %vm816_vm1 = vcmp.ge.f32.partialorder %v662_v3, 0.0 }
 0x1c7   :  { %v2262_v38 = vpop.f32.mrb[8].mxu0  ;;  %v847_v57 = vmul.f32 0.01, %v657_v1  ;;  %vm815_vm2 = vcmp.ge.f32.partialorder %v657_v1, 0.0 }
 0x1c8   :  { %v666_v39 = vpop.f32.mrb[9].mxu0  ;;  %v672_v0 = vadd.f32 %v2262_v38, %v3040_v13  ;;  %v880_v38 = vsel %vm816_vm1, %v662_v3, %v848_v61 }
 0x1c9   :  { %v667_v63 = vadd.f32 %v666_v39, %v3038_v12 }
 0x1ca   :  { %v850_v56 = vmul.f32 0.01, %v672_v0  ;;  %vm818_vm3 = vcmp.ge.f32.partialorder %v672_v0, 0.0 }
 0x1cb   :  { %v2265_v42 = vpop.f32.mrb[10].mxu0  ;;  %v849_v11 = vmul.f32 0.01, %v667_v63  ;;  %vm817_vm4 = vcmp.ge.f32.partialorder %v667_v63, 0.0 }
 0x1cc   :  { %v676_v43 = vpop.f32.mrb[11].mxu0  ;;  %v682_v60 = vadd.f32 %v2265_v42, %v3044_v15  ;;  %v879_v42 = vsel %vm815_vm2, %v657_v1, %v847_v57  ;;  %v882_v53 = vsel %vm818_vm3, %v672_v0, %v850_v56 }
 0x1cd   :  { %v677_v13 = vadd.f32 %v676_v43, %v3042_v14  ;;  %v881_v54 = vsel %vm817_vm4, %v667_v63, %v849_v11 }
 0x1ce   :  { %v852_v12 = vmul.f32 0.01, %v682_v60  ;;  %vm820_vm5 = vcmp.ge.f32.partialorder %v682_v60, 0.0 }
 0x1cf   :  { %v2268_v28 = vpop.f32.mrb[12].mxu0  ;;  %vm819_vm7 = vcmp.ge.f32.partialorder %v677_v13, 0.0 }
 0x1d0   :  { %v686_v27 = vpop.f32.mrb[13].mxu0  ;;  %v692_v15 = vadd.f32 %v2268_v28, %v3048_v17  ;;  %v884_v17 = vsel %vm820_vm5, %v682_v60, %v852_v12 }
 0x1d1   :  { %v687_v14 = vadd.f32 %v686_v27, %v3046_v16 }
 0x1d2   :  { %vm822_vm9 = vcmp.ge.f32.partialorder %v692_v15, 0.0  ;;  %v854_v56 = vmul.f32 0.01, %v692_v15 }
 0x1d3   :  { %v2271_v26 = vpop.f32.mrb[14].mxu0  ;;  %v853_v28 = vmul.f32 0.01, %v687_v14  ;;  %vm821_vm12 = vcmp.ge.f32.partialorder %v687_v14, 0.0 }
 0x1d4   :  { %v3311_v25 = vpop.f32.mrb[15].mxu0  ;;  %v702_v16 = vadd.f32 %v2271_v26, %v3052_v19 }
 0x1d5   :  { %v697_v12 = vadd.f32 %v3311_v25, %v3050_v18  ;;  %v885_v18 = vsel %vm821_vm12, %v687_v14, %v853_v28 }
 0x1d6   :  { %vm824_vm15 = vcmp.ge.f32.partialorder %v702_v16, 0.0 }
 0x1d7   :  { %v3315_v7 = vpop.f32.mrb[16].mxu0  ;;  %vm823_vm1 = vcmp.ge.f32.partialorder %v697_v12, 0.0 }
 0x1d8   :  { %v3317_v6 = vpop.f32.mrb[17].mxu0  ;;  %v712_v25 = vadd.f32 %v3315_v7, %v3056_v21 }
 0x1d9   :  { %v707_v21 = vadd.f32 %v3317_v6, %v3054_v20 }
 0x1da   :  { %vm826_vm4 = vcmp.ge.f32.partialorder %v712_v25, 0.0 }
 0x1db   :  { %v3321_v4 = vpop.f32.mrb[18].mxu0  ;;  %v857_v28 = vmul.f32 0.01, %v707_v21 }
 0x1dc   :  { %v3324_v2 = vpop.f32.mrb[19].mxu0 }
 0x1df   :  { %v3328_v62 = vpop.f32.mrb[20].mxu0 }
 0x1e0   :  { %v3331_v59 = vpop.f32.mrb[21].mxu0 }
 0x1e3   :  { %v2283_v29 = vpop.f32.mrb[22].mxu0 }
 0x1e4   :  { %v742_v36 = vadd.f32 %v2283_v29, %v422_v31  ;;  %v736_v37 = vpop.f32.mrb[23].mxu0  ;;  %v851_v31 = vmul.f32 0.01, %v677_v13 }
 0x1e5   :  { %v737_v39 = vadd.f32 %v736_v37, %v3033_v10 }
 0x1e6   :  { %vm832_vm6 = vcmp.ge.f32.partialorder %v742_v36, 0.0  ;;  %v864_v55 = vmul.f32 0.01, %v742_v36 }
 0x1e7   :  { %v863_v43 = vmul.f32 0.01, %v737_v39  ;;  %v2286_v51 = vpop.f32.mrb[24].mxu0  ;;  %vm831_vm8 = vcmp.ge.f32.partialorder %v737_v39, 0.0 }
 0x1e8   :  { %v752_v61 = vadd.f32 %v2286_v51, %v432_v33  ;;  %v746_v3 = vpop.f32.mrb[25].mxu0  ;;  %v896_v29 = vsel %vm832_vm6, %v742_v36, %v864_v55  ;;  %v3346_v33 = vpop.permute.xlu0 %476 }
 0x1e9   :  { %v747_v10 = vadd.f32 %v746_v3, %v3301_v32  ;;  %v895_v57 = vsel %vm831_vm8, %v737_v39, %v863_v43  ;;  %v912_v63 = vadd.f32 %v896_v29, %v880_v38  ;;  %v883_v32 = vsel %vm819_vm7, %v677_v13, %v851_v31 }
 0x1ea   :  { %vm834_vm10 = vcmp.ge.f32.partialorder %v752_v61, 0.0  ;;  %v866_v0 = vmul.f32 0.01, %v752_v61  ;;  %v911_v1 = vadd.f32 %v895_v57, %v879_v42  ;;  %v886_v38 = vsel %vm822_vm9, %v692_v15, %v854_v56 }
 0x1eb   :  { %vm833_vm11 = vcmp.ge.f32.partialorder %v747_v10, 0.0  ;;  %v865_v27 = vmul.f32 0.01, %v747_v10  ;;  %v2289_v11 = vpop.f32.mrb[26].mxu0  ;;  %v856_v39 = vmul.f32 0.01, %v702_v16 }
 0x1ec   :  { %v762_v51 = vadd.f32 %v2289_v11, %v3305_v35  ;;  %v756_v55 = vpop.f32.mrb[27].mxu0  ;;  %2337 = vmatprep.mubr.f32.mxu1 %v911_v1  ;;  %v898_v60 = vsel %vm834_vm10, %v752_v61, %v866_v0  ;;  %v855_v31 = vmul.f32 0.01, %v697_v12  ;;  %v482_v3 = vpop.permute.xlu0 %481  ;;  %vm825_vm7 = vcmp.ge.f32.partialorder %v707_v21, 0.0 }
 0x1ed   :  { %v757_v36 = vadd.f32 %v756_v55, %v3303_v34  ;;  %2338 = vmatmul.mubr.f32.vlgmr.msra.gmra.mrb[0].mxu1 %v912_v63  ;;  %v897_v19 = vsel %vm833_vm11, %v747_v10, %v865_v27  ;;  %v914_v26 = vadd.f32 %v898_v60, %v882_v53  ;;  %v888_v29 = vsel %vm824_vm15, %v702_v16, %v856_v39 }
 0x1ee   :  { %vm836_vm13 = vcmp.ge.f32.partialorder %v762_v51, 0.0  ;;  %v868_v37 = vmul.f32 0.01, %v762_v51  ;;  %2518 = vmatpush3.bf16.msra.mxu1 %v3075_v45  ;;  %v913_v35 = vadd.f32 %v897_v19, %v881_v54  ;;  %v887_v1 = vsel %vm823_vm1, %v697_v12, %v855_v31 }
 0x1ef   :  { %vm835_vm14 = vcmp.ge.f32.partialorder %v757_v36, 0.0  ;;  %v867_v13 = vmul.f32 0.01, %v757_v36  ;;  %2365 = vmatprep.subr.mxu1 %v3072_v41  ;;  %v2292_v42 = vpop.f32.mrb[28].mxu0  ;;  %v727_v39 = vadd.f32 %v3331_v59, %v3062_v24 }
 0x1f0   :  { %v772_v53 = vadd.f32 %v2292_v42, %v3309_v44  ;;  %v766_v34 = vpop.f32.mrb[29].mxu0  ;;  %2340 = vmatprep.mubr.f32.mxu1 %v913_v35  ;;  %v900_v45 = vsel %vm836_vm13, %v762_v51, %v868_v37  ;;  %v487_v51 = vpop.permute.xlu0 %486  ;;  %v732_v37 = vadd.f32 %v3328_v62, %v3067_v30 }
 0x1f1   :  { %v767_v54 = vadd.f32 %v766_v34, %v3307_v40  ;;  %2341 = vmatmul.mubr.f32.gmra.mrb[2].mxu1 %v914_v26  ;;  %v899_v15 = vsel %vm835_vm14, %v757_v36, %v867_v13  ;;  %v916_v43 = vadd.f32 %v900_v45, %v884_v17  ;;  %v858_v40 = vmul.f32 0.01, %v712_v25 }
 0x1f2   :  { %vm838_vm2 = vcmp.ge.f32.partialorder %v772_v53, 0.0  ;;  %v870_v61 = vmul.f32 0.01, %v772_v53  ;;  %2366 = vmatpush3.msra.mxu1 %v3072_v41  ;;  %v915_v14 = vadd.f32 %v899_v15, %v883_v32  ;;  %v722_v41 = vadd.f32 %v3321_v4, %v3060_v23 }
 0x1f3   :  { %vm837_vm3 = vcmp.ge.f32.partialorder %v767_v54, 0.0  ;;  %v869_v7 = vmul.f32 0.01, %v767_v54  ;;  %v2295_v44 = vpop.f32.mrb[30].mxu0  ;;  %v890_v11 = vsel %vm826_vm4, %v712_v25, %v858_v40  ;;  %v889_v26 = vsel %vm825_vm7, %v707_v21, %v857_v28  ;;  %v3728_v28 = vld [vmem:[#allocation23_spill] sm:$0xff] }
 0x1f4   :  { %v782_v10 = vadd.f32 %v2295_v44, %v3319_v5  ;;  %v776_v17 = vpop.f32.mrb[31].mxu0  ;;  %2343 = vmatprep.mubr.f32.mxu1 %v915_v14  ;;  %v902_v57 = vsel %vm838_vm2, %v772_v53, %v870_v61  ;;  %v717_v5 = vadd.f32 %v3324_v2, %v3058_v22  ;;  %vm828_vm8 = vcmp.ge.f32.partialorder %v722_v41, 0.0  ;;  %v492_v34 = vpop.permute.xlu0 %491 }
 0x1f5   :  { %v777_v63 = vadd.f32 %v776_v17, %v3313_v8  ;;  %2344 = vmatmul.mubr.f32.gmra.mrb[4].mxu1 %v916_v43  ;;  %v901_v56 = vsel %vm837_vm3, %v767_v54, %v869_v7  ;;  %v918_v20 = vadd.f32 %v902_v57, %v886_v38  ;;  %v860_v12 = vmul.f32 0.01, %v722_v41 }
 0x1f6   :  { %vm840_vm5 = vcmp.ge.f32.partialorder %v782_v10, 0.0  ;;  %v872_v6 = vmul.f32 0.01, %v782_v10  ;;  %v917_v0 = vadd.f32 %v901_v56, %v885_v18  ;;  %v859_v36 = vmul.f32 0.01, %v717_v5  ;;  %v3723_v56 = vld [vmem:[#allocation18_spill] sm:$0xff] }
 0x1f7   :  { %vm839_vm6 = vcmp.ge.f32.partialorder %v777_v63, 0.0  ;;  %v871_v16 = vmul.f32 0.01, %v777_v63  ;;  %v2298_v27 = vpop.f32.mrb[32].mxu0  ;;  %vm827_vm11 = vcmp.ge.f32.partialorder %v717_v5, 0.0  ;;  %v892_v62 = vsel %vm828_vm8, %v722_v41, %v860_v12  ;;  %v3715_v41 = vld [vmem:[#allocation10_spill] sm:$0xff] }
 0x1f8   :  { %v792_v23 = vadd.f32 %v2298_v27, %v3338_v52  ;;  %v786_v4 = vpop.f32.mrb[33].mxu0  ;;  %2346 = vmatprep.mubr.f32.mxu1 %v917_v0  ;;  %v904_v8 = vsel %vm840_vm5, %v782_v10, %v872_v6  ;;  %v891_v30 = vsel %vm827_vm11, %v717_v5, %v859_v36  ;;  %vm830_vm14 = vcmp.ge.f32.partialorder %v732_v37, 0.0  ;;  %v3725_v6 = vld [vmem:[#allocation20_spill] sm:$0xff]  ;;  %v3726_v0 = vld [vmem:[#allocation21_spill] sm:$0xff]  ;;  %v3731_v27 = vld [vmem:[#allocation26_spill] sm:$0xff] }
 0x1f9   :  { %v787_v55 = vadd.f32 %v786_v4, %v3333_v58  ;;  %2347 = vmatmul.mubr.f32.gmra.mrb[6].mxu1 %v918_v20  ;;  %v903_v60 = vsel %vm839_vm6, %v777_v63, %v871_v16  ;;  %v920_v32 = vadd.f32 %v904_v8, %v888_v29  ;;  %v862_v15 = vmul.f32 0.01, %v732_v37  ;;  %v3716_v63 = vld [vmem:[#allocation11_spill] sm:$0xff]  ;;  %v3729_v5 = vld [vmem:[#allocation24_spill] sm:$0xff]  ;;  %v3730_v16 = vld [vmem:[#allocation25_spill] sm:$0xff] }
 0x1fa   :  { %vm842_vm9 = vcmp.ge.f32.partialorder %v792_v23, 0.0  ;;  %v874_v22 = vmul.f32 0.01, %v792_v23  ;;  %v919_v2 = vadd.f32 %v903_v60, %v887_v1  ;;  %vm829_vm15 = vcmp.ge.f32.partialorder %v727_v39, 0.0  ;;  %v3724_v20 = vld [vmem:[#allocation19_spill] sm:$0xff]  ;;  %v3727_v1 = vld [vmem:[#allocation22_spill] sm:$0xff] }
 0x1fb   :  { %vm841_vm10 = vcmp.ge.f32.partialorder %v787_v55, 0.0  ;;  %v873_v19 = vmul.f32 0.01, %v787_v55  ;;  %v2301_v52 = vpop.f32.mrb[34].mxu0  ;;  %v894_v44 = vsel %vm830_vm14, %v732_v37, %v862_v15  ;;  %v3733_v4 = vld [vmem:[#allocation28_spill] sm:$0xff]  ;;  %v3734_v8 = vld [vmem:[#allocation29_spill] sm:$0xff] }
 0x1fc   :  { %v802_v35 = vadd.f32 %v2301_v52, %v482_v3  ;;  %v796_v38 = vpop.f32.mrb[35].mxu0  ;;  %2349 = vmatprep.mubr.f32.mxu1 %v919_v2  ;;  %v906_v58 = vsel %vm842_vm9, %v792_v23, %v874_v22  ;;  %v3732_v23 = vld [vmem:[#allocation27_spill] sm:$0xff]  ;;  %v3738_v60 = vld [vmem:[#allocation33_spill] sm:$0xff]  ;;  %v1780_v22 = vld [vmem:[%s3658_s7 + $0x30] sm:$0xff] }
 0x1fd   :  { %v797_v13 = vadd.f32 %v796_v38, %v3346_v33  ;;  %2350 = vmatmul.mubr.f32.gmra.mrb[8].mxu1 %v920_v32  ;;  %v905_v42 = vsel %vm841_vm10, %v787_v55, %v873_v19  ;;  %v922_v18 = vadd.f32 %v906_v58, %v890_v11  ;;  %v861_v33 = vmul.f32 0.01, %v727_v39  ;;  %v3735_v11 = vld [vmem:[#allocation30_spill] sm:$0xff]  ;;  %v3737_v55 = vld [vmem:[#allocation32_spill] sm:$0xff]  ;;  %v3740_v12 = vld [vmem:[#allocation35_spill] sm:$0xff] }
 0x1fe   :  { %vm844_vm12 = vcmp.ge.f32.partialorder %v802_v35, 0.0  ;;  %v876_v25 = vmul.f32 0.01, %v802_v35  ;;  %v921_v53 = vadd.f32 %v905_v42, %v889_v26  ;;  %v3739_v32 = vld [vmem:[#allocation34_spill] sm:$0xff]  ;;  %v1781_v2 = vld [vmem:[%s3658_s7 + $0x38] sm:$0xff]  ;;  %v1782_v19 = vld [vmem:[%s3658_s7 + $0x40] sm:$0xff] }
 0x1ff   :  { %vm843_vm13 = vcmp.ge.f32.partialorder %v797_v13, 0.0  ;;  %v875_v45 = vmul.f32 0.01, %v797_v13  ;;  %v2304_v54 = vpop.f32.mrb[36].mxu0  ;;  %v893_v40 = vsel %vm829_vm15, %v727_v39, %v861_v33  ;;  %v2531_v36 = vpack.c.bf16 %v1781_v2, %v1780_v22  ;;  %v1783_v52 = vld [vmem:[%s3658_s7 + $0x48] sm:$0xff]  ;;  %v1784_v37 = vld [vmem:[%s3658_s7 + $0x50] sm:$0xff] }
 0x200   :  { %v812_v43 = vadd.f32 %v2304_v54, %v492_v34  ;;  %v806_v24 = vpop.f32.mrb[37].mxu0  ;;  %2352 = vmatprep.mubr.f32.mxu1 %v921_v53  ;;  %v908_v59 = vsel %vm844_vm12, %v802_v35, %v876_v25  ;;  %v2535_v26 = vpack.c.bf16 %v1783_v52, %v1782_v19  ;;  %v1785_v35 = vld [vmem:[%s3658_s7 + $0x58] sm:$0xff]  ;;  %v1786_v58 = vld [vmem:[%s3658_s7 + $0x60] sm:$0xff]  ;;  %v1787_v39 = vld [vmem:[%s3658_s7 + $0x68] sm:$0xff]  ;;  %v3477_v53 = vpop.permute.xlu0 %1183 }
 0x201   :  { %v807_v31 = vadd.f32 %v806_v24, %v487_v51  ;;  %2353 = vmatmul.mubr.f32.gmra.mrb[10].mxu1 %v922_v18  ;;  %v907_v61 = vsel %vm843_vm13, %v797_v13, %v875_v45  ;;  %v924_v14 = vadd.f32 %v908_v59, %v892_v62  ;;  %v3736_v51 = vld [vmem:[#allocation31_spill] sm:$0xff]  ;;  %2532 = vmatprep.subr.bf16.mxu0 %v2531_v36  ;;  %v1788_v42 = vld [vmem:[%s3658_s7 + $0x70] sm:$0xff]  ;;  %v3482_v34 = vld [vmem:[%s3659_s8] ss:$0 sm:$0xff]  ;;  %v3485_v62 = vpop.permute.xlu1 %1263 }
 0x202   :  { %vm846_vm1 = vcmp.ge.f32.partialorder %v812_v43, 0.0  ;;  %v878_v3 = vmul.f32 0.01, %v812_v43  ;;  %v923_v21 = vadd.f32 %v907_v61, %v891_v30  ;;  %2534 = vmatpush3.bf16.msra.mxu0 %v2531_v36  ;;  %v2539_v38 = vpack.c.bf16 %v1785_v35, %v1784_v37  ;;  %v1789_v18 = vld [vmem:[%s3658_s7 + $0x78] sm:$0xff]  ;;  %s2630_s7 = smov [#allocation5]  }
 0x203   :  { %vm845_vm2 = vcmp.ge.f32.partialorder %v807_v31, 0.0  ;;  %v877_v7 = vmul.f32 0.01, %v807_v31  ;;  %2536 = vmatprep.subr.bf16.mxu0 %v2535_v26  ;;  %v2543_v13 = vpack.c.bf16 %v1787_v39, %v1786_v58  ;;  %v2547_v25 = vpack.c.bf16 %v1789_v18, %v1788_v42  ;;  %s1976_s8 = sshll.u32 %s2630_s7, 4  ;;  %s1977_s8 = int_to_ptr.vmem [resolvable:$true] %s1976_s8 }
 0x204   :  { %2355 = vmatprep.mubr.f32.mxu1 %v923_v21  ;;  %v910_v29 = vsel %vm846_vm1, %v812_v43, %v878_v3  ;;  %v3488_v43 = vpop.permute.xlu0 %1188  ;;  %s2559_s23 = scalar_lea.vmem %s1977_s8, 512  ;;  %p2564_p1 = scmp.lt.s32.totalorder %s1977_s8, %s1977_s8 }
 0x205   :  { %2356 = vmatmul.mubr.f32.gmra.mrb[12].mxu1 %v924_v14  ;;  %v909_v10 = vsel %vm845_vm2, %v807_v31, %v877_v7  ;;  %v926_v17 = vadd.f32 %v910_v29, %v894_v44  ;;  %v3492_v61 = vpop.permute.xlu1 %1268  ;;  %p2560_p0 = scmp.ne.s32.totalorder %s1977_s8, %s2559_s23  ;;  %p2565_p2 = scmp.lt.s32.totalorder %s2559_s23, %s2559_s23 }
 0x206   :  { %v925_v57 = vadd.f32 %v909_v10, %v893_v40  ;;  %2538 = vmatpush3.bf16.msra.mxu0 %v2535_v26 }
 0x207   :  { %2540 = vmatprep.subr.bf16.mxu0 %v2539_v38  ;;  %p2566_p3 = por %p2565_p2, %p2564_p1 }
 0x208   :  { %2358 = vmatprep.mubr.f32.mxu1 %v925_v57  ;;  %v3495_v7 = vpop.permute.xlu0 %1193 }
 0x209   :  { %2359 = vmatmul.mubr.f32.gmra.mrb[14].mxu1 %v926_v17  ;;  %v3499_v17 = vpop.permute.xlu1 %1273  ;;  %p2567_p4 = pnand %p2566_p3, %p2560_p0 }
 0x20a   :  { %2367 = vmatprep.mubr.msk.f32.mxu1 %vm49_vm0, %v3016_v9  ;;  %v3717_v9 = vld [vmem:[#allocation12_spill] sm:$0xff]  ;;  %2542 = vmatpush3.bf16.msra.mxu0 %v2539_v38 }
 0x20b   :  { %2544 = vmatprep.subr.bf16.mxu0 %v2543_v13 }
 0x20d   :  { %2368 = vmatmul.mubr.msk.f32.vlgmr.msra.gmra.mrb[16].mxu1 %vm49_vm0, %v3080_v46  ;;  %v3718_v46 = vld [vmem:[#allocation13_spill] sm:$0xff] }
 0x20e   :  { %2370 = vmatprep.mubr.msk.f32.mxu1 %vm49_vm0, %v3086_v47  ;;  %v3719_v47 = vld [vmem:[#allocation14_spill] sm:$0xff]  ;;  %2546 = vmatpush3.bf16.msra.mxu0 %v2543_v13 }
 0x20f   :  { %2548 = vmatprep.subr.bf16.mxu0 %v2547_v25 }
 0x211   :  { %2371 = vmatmul.mubr.msk.f32.gmra.mrb[18].mxu1 %vm49_vm0, %v3096_v48  ;;  %v3720_v48 = vld [vmem:[#allocation15_spill] sm:$0xff] }
 0x212   :  { %2373 = vmatprep.mubr.msk.f32.mxu1 %vm49_vm0, %v3102_v49  ;;  %v3721_v49 = vld [vmem:[#allocation16_spill] sm:$0xff]  ;;  %2550 = vmatpush3.bf16.msra.mxu0 %v2547_v25 }
 0x215   :  { %2374 = vmatmul.mubr.msk.f32.gmra.mrb[20].mxu1 %vm49_vm0, %v3112_v50  ;;  %v3722_v50 = vld [vmem:[#allocation17_spill] sm:$0xff] }
 0x216   :  { %2376 = vmatprep.mubr.msk.f32.mxu1 %vm49_vm0, %v3715_v41  ;;  %v1199_v41 = vpop.permute.xlu0 %1198 }
 0x219   :  { %2377 = vmatmul.mubr.msk.f32.gmra.mrb[22].mxu1 %vm49_vm0, %v3716_v63 }
 0x21a   :  { %2379 = vmatprep.mubr.msk.f32.mxu1 %vm49_vm0, %v3717_v9 }
 0x21d   :  { %2380 = vmatmul.mubr.msk.f32.gmra.mrb[24].mxu1 %vm49_vm0, %v3718_v46 }
 0x21e   :  { %2382 = vmatprep.mubr.msk.f32.mxu1 %vm49_vm0, %v3719_v47 }
 0x221   :  { %2383 = vmatmul.mubr.msk.f32.gmra.mrb[26].mxu1 %vm49_vm0, %v3720_v48  ;;  %v3504_v48 = vpop.permute.xlu1 %1278 }
 0x222   :  { %2385 = vmatprep.mubr.msk.f32.mxu1 %vm49_vm0, %v3721_v49 }
 0x225   :  { %2386 = vmatmul.mubr.msk.f32.gmra.mrb[28].mxu1 %vm49_vm0, %v3722_v50 }
 0x226   :  { %2388 = vmatprep.mubr.msk.f32.mxu1 %vm49_vm0, %v3723_v56 }
 0x229   :  { %2389 = vmatmul.mubr.msk.f32.gmra.mrb[30].mxu1 %vm49_vm0, %v3724_v20  ;;  %v1204_v20 = vpop.permute.xlu0 %1203 }
 0x22a   :  { %2391 = vmatprep.mubr.msk.f32.mxu1 %vm49_vm0, %v3725_v6 }
 0x22d   :  { %2392 = vmatmul.mubr.msk.f32.gmra.mrb[32].mxu1 %vm49_vm0, %v3726_v0 }
 0x22e   :  { %2394 = vmatprep.mubr.msk.f32.mxu1 %vm49_vm0, %v3727_v1 }
 0x231   :  { %2395 = vmatmul.mubr.msk.f32.gmra.mrb[34].mxu1 %vm49_vm0, %v3728_v28 }
 0x232   :  { %2397 = vmatprep.mubr.msk.f32.mxu1 %vm49_vm0, %v3729_v5  ;;  %v3509_v5 = vpop.permute.xlu1 %1283 }
 0x235   :  { %2398 = vmatmul.mubr.msk.f32.gmra.mrb[36].mxu1 %vm49_vm0, %v3730_v16 }
 0x236   :  { %2400 = vmatprep.mubr.msk.f32.mxu1 %vm49_vm0, %v3731_v27  ;;  %v1209_v27 = vpop.permute.xlu0 %1208 }
 0x239   :  { %2401 = vmatmul.mubr.msk.f32.gmra.mrb[38].mxu1 %vm49_vm0, %v3732_v23 }
 0x23a   :  { %2403 = vmatprep.mubr.msk.f32.mxu1 %vm49_vm0, %v3733_v4 }
 0x23d   :  { %2404 = vmatmul.mubr.msk.f32.gmra.mrb[40].mxu1 %vm49_vm0, %v3734_v8 }
 0x23e   :  { %2406 = vmatprep.mubr.msk.f32.mxu1 %vm49_vm0, %v3735_v11 }
 0x241   :  { %2407 = vmatmul.mubr.msk.f32.gmra.mrb[42].mxu1 %vm49_vm0, %v3736_v51  ;;  %v3514_v51 = vpop.permute.xlu1 %1288 }
 0x242   :  { %2409 = vmatprep.mubr.msk.f32.mxu1 %vm49_vm0, %v3737_v55 }
 0x245   :  { %2410 = vmatmul.mubr.msk.f32.gmra.mrb[44].mxu1 %vm49_vm0, %v3738_v60  ;;  %v3516_v2 = vpop.permute.xlu1 %1293 }
 0x246   :  { %2412 = vmatprep.mubr.msk.f32.mxu1 %vm49_vm0, %v3739_v32  ;;  %v1214_v32 = vpop.permute.xlu0 %1213 }
 0x249   :  { %2413 = vmatmul.mubr.msk.f32.gmra.mrb[46].mxu1 %vm49_vm0, %v3740_v12  ;;  %v3518_v26 = vpop.permute.xlu1 %1298 }
 0x24a   :  { %v1219_v36 = vpop.permute.xlu0 %1218 }
 0x24d   :  { %v3524_v13 = vpop.permute.xlu1 %1303 }
 0x24e   :  { %v3520_v38 = vpop.permute.xlu0 %1223 }
 0x252   :  { %v1229_v42 = vpop.permute.xlu0 %1228 }
 0x2c0   :  { %v2339_v45 = vpop.f32.mrb[0].mxu1 }
 0x2c1   :  { %v1022_v54 = vadd.f32 %v2339_v45, %v3482_v34  ;;  %v1016_v30 = vpop.f32.mrb[1].mxu1  ;;  %v3530_v45 = vpop.permute.xlu1 %1308 }
 0x2c2   :  { %v1017_v15 = vadd.f32 %v3482_v34, %v1016_v30 }
 0x2c3   :  { %1096 = vst [vmem:[#allocation7 + $0x8] sm:$0xff] %v1022_v54 }
 0x2c4   :  { %1095 = vst [vmem:[#allocation7] sm:$0xff] %v1017_v15  ;;  %v2342_v24 = vpop.f32.mrb[2].mxu1 }
 0x2c5   :  { %v1032_v59 = vadd.f32 %v2342_v24, %v3482_v34  ;;  %v1026_v33 = vpop.f32.mrb[3].mxu1  ;;  %v3537_v24 = vpop.permute.xlu0 %1233 }
 0x2c6   :  { %v1027_v31 = vadd.f32 %v3482_v34, %v1026_v33 }
 0x2c7   :  { %1098 = vst [vmem:[#allocation7 + $0x18] sm:$0xff] %v1032_v59 }
 0x2c8   :  { %1097 = vst [vmem:[#allocation7 + $0x10] sm:$0xff] %v1027_v31  ;;  %v2345_v14 = vpop.f32.mrb[4].mxu1 }
 0x2c9   :  { %v1042_v3 = vadd.f32 %v2345_v14, %v3482_v34  ;;  %v1036_v21 = vpop.f32.mrb[5].mxu1 }
 0x2ca   :  { %v1037_v44 = vadd.f32 %v3482_v34, %v1036_v21 }
 0x2cb   :  { %1100 = vst [vmem:[#allocation7 + $0x28] sm:$0xff] %v1042_v3 }
 0x2cc   :  { %1099 = vst [vmem:[#allocation7 + $0x20] sm:$0xff] %v1037_v44  ;;  %v2348_v29 = vpop.f32.mrb[6].mxu1 }
 0x2cd   :  { %v1052_v40 = vadd.f32 %v2348_v29, %v3482_v34  ;;  %v1046_v10 = vpop.f32.mrb[7].mxu1  ;;  %v3545_v29 = vpop.permute.xlu1 %1313 }
 0x2ce   :  { %v1047_v57 = vadd.f32 %v3482_v34, %v1046_v10 }
 0x2cf   :  { %1102 = vst [vmem:[#allocation7 + $0x38] sm:$0xff] %v1052_v40 }
 0x2d0   :  { %1101 = vst [vmem:[#allocation7 + $0x30] sm:$0xff] %v1047_v57  ;;  %v2351_v63 = vpop.f32.mrb[8].mxu1  ;;  %v3547_v57 = vpop.permute.xlu0 %1238 }
 0x2d1   :  { %v1062_v9 = vadd.f32 %v2351_v63, %v3482_v34  ;;  %v1056_v46 = vpop.f32.mrb[9].mxu1 }
 0x2d2   :  { %v1057_v47 = vadd.f32 %v3482_v34, %v1056_v46 }
 0x2d3   :  { %1104 = vst [vmem:[#allocation7 + $0x48] sm:$0xff] %v1062_v9 }
 0x2d4   :  { %1103 = vst [vmem:[#allocation7 + $0x40] sm:$0xff] %v1057_v47  ;;  %v2354_v49 = vpop.f32.mrb[10].mxu1 }
 0x2d5   :  { %v1072_v50 = vadd.f32 %v2354_v49, %v3482_v34  ;;  %v1066_v56 = vpop.f32.mrb[11].mxu1 }
 0x2d6   :  { %v1067_v6 = vadd.f32 %v3482_v34, %v1066_v56 }
 0x2d7   :  { %1106 = vst [vmem:[#allocation7 + $0x58] sm:$0xff] %v1072_v50 }
 0x2d8   :  { %1105 = vst [vmem:[#allocation7 + $0x50] sm:$0xff] %v1067_v6  ;;  %v2357_v0 = vpop.f32.mrb[12].mxu1 }
 0x2d9   :  { %v1082_v1 = vadd.f32 %v2357_v0, %v3482_v34  ;;  %v1076_v28 = vpop.f32.mrb[13].mxu1 }
 0x2da   :  { %v1077_v16 = vadd.f32 %v3482_v34, %v1076_v28 }
 0x2db   :  { %1108 = vst [vmem:[#allocation7 + $0x68] sm:$0xff] %v1082_v1  ;;  %v3551_v1 = vpop.permute.xlu1 %1318 }
 0x2dc   :  { %1107 = vst [vmem:[#allocation7 + $0x60] sm:$0xff] %v1077_v16  ;;  %v2360_v23 = vpop.f32.mrb[14].mxu1 }
 0x2dd   :  { %v1092_v4 = vadd.f32 %v2360_v23, %v3482_v34  ;;  %v1086_v8 = vpop.f32.mrb[15].mxu1 }
 0x2de   :  { %v1087_v11 = vadd.f32 %v3482_v34, %v1086_v8 }
 0x2df   :  { %1110 = vst [vmem:[#allocation7 + $0x78] sm:$0xff] %v1092_v4 }
 0x2e0   :  { %1109 = vst [vmem:[#allocation7 + $0x70] sm:$0xff] %v1087_v11  ;;  %v2369_v55 = vpop.f32.mrb[16].mxu1 }
 0x2e1   :  { %v1503_v60 = vpop.f32.mrb[17].mxu1  ;;  %v1509_v30 = vadd.f32 %v2369_v55, %v3488_v43 }
 0x2e2   :  { %v1504_v59 = vadd.f32 %v1503_v60, %v3477_v53 }
 0x2e3   :  { %v1695_v3 = vmul.f32 0.01, %v1509_v30  ;;  %vm1663_vm0 = vcmp.ge.f32.partialorder %v1509_v30, 0.0 }
 0x2e4   :  { %v2372_v12 = vpop.f32.mrb[18].mxu1  ;;  %v1694_v40 = vmul.f32 0.01, %v1504_v59  ;;  %vm1662_vm3 = vcmp.ge.f32.partialorder %v1504_v59, 0.0 }
 0x2e5   :  { %v1513_v22 = vpop.f32.mrb[19].mxu1  ;;  %v1519_v33 = vadd.f32 %v2372_v12, %v1199_v41 }
 0x2e6   :  { %v1514_v31 = vadd.f32 %v1513_v22, %v3495_v7  ;;  %v1727_v7 = vsel %vm1663_vm0, %v1509_v30, %v1695_v3  ;;  %v1726_v50 = vsel %vm1662_vm3, %v1504_v59, %v1694_v40 }
 0x2e7   :  { %v1697_v43 = vmul.f32 0.01, %v1519_v33  ;;  %vm1665_vm4 = vcmp.ge.f32.partialorder %v1519_v33, 0.0 }
 0x2e8   :  { %v2375_v19 = vpop.f32.mrb[20].mxu1  ;;  %v1696_v10 = vmul.f32 0.01, %v1514_v31  ;;  %vm1664_vm5 = vcmp.ge.f32.partialorder %v1514_v31, 0.0 }
 0x2e9   :  { %v1523_v52 = vpop.f32.mrb[21].mxu1  ;;  %v1529_v21 = vadd.f32 %v2375_v19, %v1209_v27  ;;  %v1729_v0 = vsel %vm1665_vm4, %v1519_v33, %v1697_v43  ;;  %v3560_v33 = vpop.permute.xlu1 %1323 }
 0x2ea   :  { %v1524_v53 = vadd.f32 %v1523_v52, %v1204_v20  ;;  %v1728_v6 = vsel %vm1664_vm5, %v1514_v31, %v1696_v10 }
 0x2eb   :  { %v1699_v63 = vmul.f32 0.01, %v1529_v21  ;;  %vm1667_vm6 = vcmp.ge.f32.partialorder %v1529_v21, 0.0 }
 0x2ec   :  { %v2378_v37 = vpop.f32.mrb[22].mxu1  ;;  %vm1666_vm8 = vcmp.ge.f32.partialorder %v1524_v53, 0.0  ;;  %v1698_v27 = vmul.f32 0.01, %v1524_v53 }
 0x2ed   :  { %v1533_v35 = vpop.f32.mrb[23].mxu1  ;;  %v1539_v47 = vadd.f32 %v2378_v37, %v1219_v36  ;;  %v1731_v8 = vsel %vm1667_vm6, %v1529_v21, %v1699_v63 }
 0x2ee   :  { %v1534_v28 = vadd.f32 %v1533_v35, %v1214_v32  ;;  %v1730_v59 = vsel %vm1666_vm8, %v1524_v53, %v1698_v27 }
 0x2ef   :  { %vm1669_vm10 = vcmp.ge.f32.partialorder %v1539_v47, 0.0  ;;  %v1701_v12 = vmul.f32 0.01, %v1539_v47 }
 0x2f0   :  { %v2381_v58 = vpop.f32.mrb[24].mxu1  ;;  %v1700_v36 = vmul.f32 0.01, %v1534_v28  ;;  %vm1668_vm13 = vcmp.ge.f32.partialorder %v1534_v28, 0.0 }
 0x2f1   :  { %v3522_v39 = vpop.f32.mrb[25].mxu1  ;;  %v1549_v19 = vadd.f32 %v2381_v58, %v1229_v42 }
 0x2f3   :  { %v1703_v43 = vmul.f32 0.01, %v1549_v19  ;;  %vm1671_vm1 = vcmp.ge.f32.partialorder %v1549_v19, 0.0 }
 0x2f4   :  { %v3526_v18 = vpop.f32.mrb[26].mxu1 }
 0x2f5   :  { %v3528_v25 = vpop.f32.mrb[27].mxu1 }
 0x2f8   :  { %v3532_v54 = vpop.f32.mrb[28].mxu1 }
 0x2f9   :  { %v3535_v15 = vpop.f32.mrb[29].mxu1 }
 0x2fc   :  { %v3541_v14 = vpop.f32.mrb[30].mxu1 }
 0x2fd   :  { %v3543_v44 = vpop.f32.mrb[31].mxu1 }
 0x300   :  { %v2393_v41 = vpop.f32.mrb[32].mxu1 }
 0x301   :  { %v1589_v9 = vadd.f32 %v2393_v41, %v3492_v61  ;;  %v1583_v46 = vpop.f32.mrb[33].mxu1  ;;  %v1732_v41 = vsel %vm1668_vm13, %v1534_v28, %v1700_v36 }
 0x302   :  { %v1584_v49 = vadd.f32 %v1583_v46, %v3485_v62  ;;  %v3555_v62 = vpop.permute.xlu0 %1243 }
 0x303   :  { %vm1679_vm7 = vcmp.ge.f32.partialorder %v1589_v9, 0.0  ;;  %v1711_v56 = vmul.f32 0.01, %v1589_v9 }
 0x304   :  { %vm1678_vm9 = vcmp.ge.f32.partialorder %v1584_v49, 0.0  ;;  %v1710_v20 = vmul.f32 0.01, %v1584_v49  ;;  %v2396_v16 = vpop.f32.mrb[34].mxu1 }
 0x305   :  { %v1743_v23 = vsel %vm1679_vm7, %v1589_v9, %v1711_v56  ;;  %v1599_v61 = vadd.f32 %v2396_v16, %v3504_v48  ;;  %v1593_v4 = vpop.f32.mrb[35].mxu1  ;;  %v1329_v56 = vpop.permute.xlu1 %1328 }
 0x306   :  { %v1759_v11 = vadd.f32 %v1743_v23, %v1727_v7  ;;  %v1594_v55 = vadd.f32 %v1593_v4, %v3499_v17  ;;  %v1742_v60 = vsel %vm1678_vm9, %v1584_v49, %v1710_v20  ;;  %v1544_v17 = vadd.f32 %v3522_v39, %v3520_v38  ;;  %v1249_v40 = vpop.permute.xlu0 %1248 }
 0x307   :  { %vm1681_vm11 = vcmp.ge.f32.partialorder %v1599_v61, 0.0  ;;  %v1713_v32 = vmul.f32 0.01, %v1599_v61  ;;  %v1758_v22 = vadd.f32 %v1742_v60, %v1726_v50  ;;  %v1559_v38 = vadd.f32 %v3526_v18, %v3547_v57 }
 0x308   :  { %vm1680_vm12 = vcmp.ge.f32.partialorder %v1594_v55, 0.0  ;;  %v1712_v52 = vmul.f32 0.01, %v1594_v55  ;;  %v2399_v37 = vpop.f32.mrb[36].mxu1  ;;  %vm1670_vm2 = vcmp.ge.f32.partialorder %v1544_v17, 0.0  ;;  %v1735_v57 = vsel %vm1671_vm1, %v1549_v19, %v1703_v43 }
 0x309   :  { %v1609_v48 = vadd.f32 %v2399_v37, %v3514_v51  ;;  %v1603_v35 = vpop.f32.mrb[37].mxu1  ;;  %2447 = vmatprep.mubr.f32.mxu0 %v1758_v22  ;;  %v1745_v30 = vsel %vm1681_vm11, %v1599_v61, %v1713_v32  ;;  %v1733_v51 = vsel %vm1669_vm10, %v1539_v47, %v1701_v12  ;;  %v1702_v47 = vmul.f32 0.01, %v1544_v17  ;;  %v1334_v22 = vpop.permute.xlu1 %1333 }
 0x30a   :  { %v1604_v31 = vadd.f32 %v1603_v35, %v3509_v5  ;;  %2448 = vmatmul.mubr.f32.vlgmr.msra.gmra.mrb[38].mxu0 %v1759_v11  ;;  %v1744_v58 = vsel %vm1680_vm12, %v1594_v55, %v1712_v52  ;;  %v1761_v42 = vadd.f32 %v1745_v30, %v1729_v0  ;;  %vm1673_vm4 = vcmp.ge.f32.partialorder %v1559_v38, 0.0  ;;  %v1254_v16 = vpop.permute.xlu0 %1253 }
 0x30b   :  { %vm1683_vm14 = vcmp.ge.f32.partialorder %v1609_v48, 0.0  ;;  %v1715_v3 = vmul.f32 0.01, %v1609_v48  ;;  %v1760_v21 = vadd.f32 %v1744_v58, %v1728_v6  ;;  %v1554_v6 = vadd.f32 %v3528_v25, %v3537_v24 }
 0x30c   :  { %vm1682_vm15 = vcmp.ge.f32.partialorder %v1604_v31, 0.0  ;;  %v1714_v10 = vmul.f32 0.01, %v1604_v31  ;;  %v2402_v53 = vpop.f32.mrb[38].mxu1  ;;  %v1705_v0 = vmul.f32 0.01, %v1559_v38  ;;  %v1569_v27 = vadd.f32 %v3532_v54, %v1249_v40 }
 0x30d   :  { %v1619_v5 = vadd.f32 %v2402_v53, %v3518_v26  ;;  %v1613_v39 = vpop.f32.mrb[39].mxu1  ;;  %2450 = vmatprep.mubr.f32.mxu0 %v1760_v21  ;;  %v1747_v7 = vsel %vm1683_vm14, %v1609_v48, %v1715_v3  ;;  %v1704_v11 = vmul.f32 0.01, %v1554_v6  ;;  %vm1672_vm7 = vcmp.ge.f32.partialorder %v1554_v6, 0.0 }
 0x30e   :  { %v1614_v63 = vadd.f32 %v1613_v39, %v3516_v2  ;;  %2451 = vmatmul.mubr.f32.gmra.mrb[40].mxu0 %v1761_v42  ;;  %v1746_v9 = vsel %vm1682_vm15, %v1604_v31, %v1714_v10  ;;  %v1763_v46 = vadd.f32 %v1747_v7, %v1731_v8  ;;  %v1734_v8 = vsel %vm1670_vm2, %v1544_v17, %v1702_v47  ;;  %v1259_v48 = vpop.permute.xlu0 %1258  ;;  %v1339_v10 = vpop.permute.xlu1 %1338 }
 0x30f   :  { %vm1685_vm0 = vcmp.ge.f32.partialorder %v1619_v5, 0.0  ;;  %v1717_v49 = vmul.f32 0.01, %v1619_v5  ;;  %v1762_v50 = vadd.f32 %v1746_v9, %v1730_v59  ;;  %v1737_v32 = vsel %vm1673_vm4, %v1559_v38, %v1705_v0 }
 0x310   :  { %vm1684_vm3 = vcmp.ge.f32.partialorder %v1614_v63, 0.0  ;;  %v1716_v18 = vmul.f32 0.01, %v1614_v63  ;;  %v2405_v26 = vpop.f32.mrb[40].mxu1  ;;  %vm1675_vm8 = vcmp.ge.f32.partialorder %v1569_v27, 0.0  ;;  %v1736_v59 = vsel %vm1672_vm7, %v1554_v6, %v1704_v11 }
 0x311   :  { %v1629_v2 = vadd.f32 %v2405_v26, %v3530_v45  ;;  %v1623_v28 = vpop.f32.mrb[41].mxu1  ;;  %2453 = vmatprep.mubr.f32.mxu0 %v1762_v50  ;;  %v1749_v20 = vsel %vm1685_vm0, %v1619_v5, %v1717_v49  ;;  %v1564_v45 = vadd.f32 %v3535_v15, %v3555_v62  ;;  %v1707_v37 = vmul.f32 0.01, %v1569_v27 }
 0x312   :  { %v1624_v23 = vadd.f32 %v1623_v28, %v3524_v13  ;;  %2454 = vmatmul.mubr.f32.gmra.mrb[42].mxu0 %v1763_v46  ;;  %v1748_v61 = vsel %vm1684_vm3, %v1614_v63, %v1716_v18  ;;  %v1765_v25 = vadd.f32 %v1749_v20, %v1733_v51  ;;  %v1579_v17 = vadd.f32 %v3541_v14, %v1259_v48 }
 0x313   :  { %vm1687_vm5 = vcmp.ge.f32.partialorder %v1629_v2, 0.0  ;;  %v1719_v24 = vmul.f32 0.01, %v1629_v2  ;;  %v1764_v4 = vadd.f32 %v1748_v61, %v1732_v41  ;;  %v1706_v35 = vmul.f32 0.01, %v1564_v45 }
 0x314   :  { %vm1686_vm6 = vcmp.ge.f32.partialorder %v1624_v23, 0.0  ;;  %v1718_v55 = vmul.f32 0.01, %v1624_v23  ;;  %v2408_v60 = vpop.f32.mrb[42].mxu1  ;;  %vm1674_vm11 = vcmp.ge.f32.partialorder %v1564_v45, 0.0  ;;  %v1574_v42 = vadd.f32 %v3543_v44, %v1254_v16 }
 0x315   :  { %v1639_v54 = vadd.f32 %v2408_v60, %v3551_v1  ;;  %v1633_v12 = vpop.f32.mrb[43].mxu1  ;;  %2456 = vmatprep.mubr.f32.mxu0 %v1764_v4  ;;  %v1751_v13 = vsel %vm1687_vm5, %v1629_v2, %v1719_v24  ;;  %v1738_v14 = vsel %vm1674_vm11, %v1564_v45, %v1706_v35  ;;  %v1739_v38 = vsel %vm1675_vm8, %v1569_v27, %v1707_v37 }
 0x316   :  { %v1634_v36 = vadd.f32 %v1633_v12, %v3545_v29  ;;  %2457 = vmatmul.mubr.f32.gmra.mrb[44].mxu0 %v1765_v25  ;;  %v1750_v19 = vsel %vm1686_vm6, %v1624_v23, %v1718_v55  ;;  %v1767_v52 = vadd.f32 %v1751_v13, %v1735_v57  ;;  %vm1677_vm14 = vcmp.ge.f32.partialorder %v1579_v17, 0.0 }
 0x317   :  { %vm1689_vm9 = vcmp.ge.f32.partialorder %v1639_v54, 0.0  ;;  %v1721_v15 = vmul.f32 0.01, %v1639_v54  ;;  %v1766_v62 = vadd.f32 %v1750_v19, %v1734_v8  ;;  %v1709_v5 = vmul.f32 0.01, %v1579_v17 }
 0x318   :  { %vm1688_vm10 = vcmp.ge.f32.partialorder %v1634_v36, 0.0  ;;  %v1720_v1 = vmul.f32 0.01, %v1634_v36  ;;  %v2411_v30 = vpop.f32.mrb[44].mxu1  ;;  %v1708_v7 = vmul.f32 0.01, %v1574_v42 }
 0x319   :  { %v1649_v31 = vadd.f32 %v2411_v30, %v1329_v56  ;;  %v1643_v58 = vpop.f32.mrb[45].mxu1  ;;  %2459 = vmatprep.mubr.f32.mxu0 %v1766_v62  ;;  %v1753_v29 = vsel %vm1689_vm9, %v1639_v54, %v1721_v15  ;;  %vm1676_vm15 = vcmp.ge.f32.partialorder %v1574_v42, 0.0  ;;  %v1741_v56 = vsel %vm1677_vm14, %v1579_v17, %v1709_v5 }
 0x31a   :  { %v1644_v3 = vadd.f32 %v1643_v58, %v3560_v33  ;;  %2460 = vmatmul.mubr.f32.gmra.mrb[46].mxu0 %v1767_v52  ;;  %v1752_v21 = vsel %vm1688_vm10, %v1634_v36, %v1720_v1  ;;  %v1769_v51 = vadd.f32 %v1753_v29, %v1737_v32  ;;  %v1740_v18 = vsel %vm1676_vm15, %v1574_v42, %v1708_v7 }
 0x31b   :  { %vm1691_vm12 = vcmp.ge.f32.partialorder %v1649_v31, 0.0  ;;  %v1723_v40 = vmul.f32 0.01, %v1649_v31  ;;  %v1768_v43 = vadd.f32 %v1752_v21, %v1736_v59 }
 0x31c   :  { %vm1690_vm13 = vcmp.ge.f32.partialorder %v1644_v3, 0.0  ;;  %v1722_v53 = vmul.f32 0.01, %v1644_v3  ;;  %v2414_v41 = vpop.f32.mrb[46].mxu1 }
 0x31d   :  { %v1659_v39 = vadd.f32 %v2414_v41, %v1339_v10  ;;  %v1653_v44 = vpop.f32.mrb[47].mxu1  ;;  %2462 = vmatprep.mubr.f32.mxu0 %v1768_v43  ;;  %v1755_v33 = vsel %vm1691_vm12, %v1649_v31, %v1723_v40 }
 0x31e   :  { %v1654_v63 = vadd.f32 %v1653_v44, %v1334_v22  ;;  %2463 = vmatmul.mubr.f32.gmra.mrb[48].mxu0 %v1769_v51  ;;  %v1754_v9 = vsel %vm1690_vm13, %v1644_v3, %v1722_v53  ;;  %v1771_v46 = vadd.f32 %v1755_v33, %v1739_v38 }
 0x31f   :  { %vm1693_vm1 = vcmp.ge.f32.partialorder %v1659_v39, 0.0  ;;  %v1725_v47 = vmul.f32 0.01, %v1659_v39  ;;  %v1770_v49 = vadd.f32 %v1754_v9, %v1738_v14 }
 0x320   :  { %vm1692_vm2 = vcmp.ge.f32.partialorder %v1654_v63, 0.0  ;;  %v1724_v50 = vmul.f32 0.01, %v1654_v63 }
 0x321   :  { %2465 = vmatprep.mubr.f32.mxu0 %v1770_v49  ;;  %v1757_v6 = vsel %vm1693_vm1, %v1659_v39, %v1725_v47 }
 0x322   :  { %2466 = vmatmul.mubr.f32.gmra.mrb[50].mxu0 %v1771_v46  ;;  %v1756_v26 = vsel %vm1692_vm2, %v1654_v63, %v1724_v50  ;;  %v1773_v57 = vadd.f32 %v1757_v6, %v1741_v56 }
 0x323   :  { %v1772_v0 = vadd.f32 %v1756_v26, %v1740_v18 }
 0x325   :  { %2468 = vmatprep.mubr.f32.mxu0 %v1772_v0 }
 0x326   :  { %2469 = vmatmul.mubr.f32.gmra.mrb[52].mxu0 %v1773_v57 }
 0x327   :  { %2570 = shalt.err (!%p2567_p4)
}
 0x328   :  { %s2571_s24 = scalar_lea.hbm %s3661_s10, 512 }
 0x329   :  { %p2572_p5 = scmp.ne.s32.totalorder %s3661_s10, %s2571_s24  ;;  %p2575_p6 = scmp.lt.u32.totalorder %s2571_s24, %s3661_s10 }
 0x32b   :  { %p2577_p7 = pnand %p2575_p6, %p2572_p5 }
 0x32d   :  { %2580 = shalt.err (!%p2577_p7)
}
 0x32e   :  { %s2632_s3 = smov 128   ;;  %s2633_s27 = smov 8  }
 0x32f   :  { %1982 = dma.vmem_to_hbm [thread:$0]  %s1977_s8, 512, %s3661_s10, [#allocation6], %s2632_s3, %s2632_s3, %s2633_s27  }
 0x330   :  { %s2581_s30 = scalar_lea.vmem %s1965_s22, 256  ;;  %p2586_p9 = scmp.lt.s32.totalorder %s1965_s22, %s1965_s22 }
 0x331   :  { %p2582_p8 = scmp.ne.s32.totalorder %s1965_s22, %s2581_s30  ;;  %p2587_p10 = scmp.lt.s32.totalorder %s2581_s30, %s2581_s30 }
 0x333   :  { %p2588_p11 = por %p2587_p10, %p2586_p9 }
 0x335   :  { %p2589_p12 = pnand %p2588_p11, %p2582_p8 }
 0x337   :  { %2592 = shalt.err (!%p2589_p12)
}
 0x338   :  { %s2593_s14 = scalar_lea.hbm %s3660_s9, 256 }
 0x339   :  { %p2594_p13 = scmp.ne.s32.totalorder %s3660_s9, %s2593_s14  ;;  %p2597_p0 = scmp.lt.u32.totalorder %s2593_s14, %s3660_s9 }
 0x33b   :  { %p2599_p1 = pnand %p2597_p0, %p2594_p13 }
 0x33d   :  { %2602 = shalt.err (!%p2599_p1)
}
 0x33e   :  { %1970 = dma.vmem_to_hbm [thread:$0]  %s1965_s22, 256, %s3660_s9, [#allocation4], %s2632_s3, %s2632_s3, %s2633_s27  }
 0x33f   :  { %s2634_s9 = smov [#allocation7]  }
 0x340   :  { %s1988_s19 = sshll.u32 %s2634_s9, 4  ;;  %s1989_s19 = int_to_ptr.vmem [resolvable:$true] %s1988_s19 }
 0x341   :  { %s2603_s20 = scalar_lea.vmem %s1989_s19, 4096  ;;  %p2608_p3 = scmp.lt.s32.totalorder %s1989_s19, %s1989_s19 }
 0x342   :  { %p2604_p2 = scmp.ne.s32.totalorder %s1989_s19, %s2603_s20  ;;  %p2609_p4 = scmp.lt.s32.totalorder %s2603_s20, %s2603_s20 }
 0x344   :  { %p2610_p5 = por %p2609_p4, %p2608_p3 }
 0x346   :  { %p2611_p6 = pnand %p2610_p5, %p2604_p2 }
 0x3dd   :  { %v2449_v2 = vpop.f32.mrb[38].mxu0 }
 0x3de   :  { %v1869_v28 = vadd.f32 %v2449_v2, %v3482_v34  ;;  %v1863_v20 = vpop.f32.mrb[39].mxu0 }
 0x3df   :  { %v1864_v16 = vadd.f32 %v3482_v34, %v1863_v20 }
 0x3e0   :  { %1944 = vst [vmem:[#allocation7 + $0x88] sm:$0xff] %v1869_v28 }
 0x3e1   :  { %1943 = vst [vmem:[#allocation7 + $0x80] sm:$0xff] %v1864_v16  ;;  %v2452_v27 = vpop.f32.mrb[40].mxu0 }
 0x3e2   :  { %v1879_v23 = vadd.f32 %v2452_v27, %v3482_v34  ;;  %v1873_v61 = vpop.f32.mrb[41].mxu0 }
 0x3e3   :  { %v1874_v25 = vadd.f32 %v3482_v34, %v1873_v61 }
 0x3e4   :  { %1946 = vst [vmem:[#allocation7 + $0x98] sm:$0xff] %v1879_v23 }
 0x3e5   :  { %1945 = vst [vmem:[#allocation7 + $0x90] sm:$0xff] %v1874_v25  ;;  %v2455_v24 = vpop.f32.mrb[42].mxu0 }
 0x3e6   :  { %v1889_v4 = vadd.f32 %v2455_v24, %v3482_v34  ;;  %v1883_v8 = vpop.f32.mrb[43].mxu0 }
 0x3e7   :  { %v1884_v11 = vadd.f32 %v3482_v34, %v1883_v8 }
 0x3e8   :  { %1948 = vst [vmem:[#allocation7 + $0xa8] sm:$0xff] %v1889_v4 }
 0x3e9   :  { %1947 = vst [vmem:[#allocation7 + $0xa0] sm:$0xff] %v1884_v11  ;;  %v2458_v45 = vpop.f32.mrb[44].mxu0 }
 0x3ea   :  { %v1899_v55 = vadd.f32 %v2458_v45, %v3482_v34  ;;  %v1893_v60 = vpop.f32.mrb[45].mxu0 }
 0x3eb   :  { %v1894_v54 = vadd.f32 %v3482_v34, %v1893_v60 }
 0x3ec   :  { %1950 = vst [vmem:[#allocation7 + $0xb8] sm:$0xff] %v1899_v55 }
 0x3ed   :  { %1949 = vst [vmem:[#allocation7 + $0xb0] sm:$0xff] %v1894_v54  ;;  %v2461_v12 = vpop.f32.mrb[46].mxu0 }
 0x3ee   :  { %v1909_v13 = vadd.f32 %v2461_v12, %v3482_v34  ;;  %v1903_v32 = vpop.f32.mrb[47].mxu0 }
 0x3ef   :  { %v1904_v22 = vadd.f32 %v3482_v34, %v1903_v32 }
 0x3f0   :  { %1952 = vst [vmem:[#allocation7 + $0xc8] sm:$0xff] %v1909_v13 }
 0x3f1   :  { %1951 = vst [vmem:[#allocation7 + $0xc0] sm:$0xff] %v1904_v22  ;;  %v2464_v36 = vpop.f32.mrb[48].mxu0 }
 0x3f2   :  { %v1919_v19 = vadd.f32 %v2464_v36, %v3482_v34  ;;  %v1913_v52 = vpop.f32.mrb[49].mxu0 }
 0x3f3   :  { %v1914_v37 = vadd.f32 %v3482_v34, %v1913_v52 }
 0x3f4   :  { %1954 = vst [vmem:[#allocation7 + $0xd8] sm:$0xff] %v1919_v19 }
 0x3f5   :  { %1953 = vst [vmem:[#allocation7 + $0xd0] sm:$0xff] %v1914_v37  ;;  %v2467_v15 = vpop.f32.mrb[50].mxu0 }
 0x3f6   :  { %v1929_v62 = vadd.f32 %v2467_v15, %v3482_v34  ;;  %v1923_v48 = vpop.f32.mrb[51].mxu0 }
 0x3f7   :  { %v1924_v35 = vadd.f32 %v3482_v34, %v1923_v48 }
 0x3f8   :  { %1956 = vst [vmem:[#allocation7 + $0xe8] sm:$0xff] %v1929_v62 }
 0x3f9   :  { %1955 = vst [vmem:[#allocation7 + $0xe0] sm:$0xff] %v1924_v35  ;;  %v2470_v1 = vpop.f32.mrb[52].mxu0 }
 0x3fa   :  { %v1939_v30 = vadd.f32 %v2470_v1, %v3482_v34  ;;  %v1933_v59 = vpop.f32.mrb[53].mxu0 }
 0x3fb   :  { %v1934_v17 = vadd.f32 %v3482_v34, %v1933_v59 }
 0x3fc   :  { %1958 = vst [vmem:[#allocation7 + $0xf8] sm:$0xff] %v1939_v30 }
 0x3fd   :  { %1957 = vst [vmem:[#allocation7 + $0xf0] sm:$0xff] %v1934_v17 }
 0x3fe   :  { %2614 = shalt.err (!%p2611_p6)
}
 0x3ff   :  { %s2615_s8 = scalar_lea.hbm %s3662_s11, 4096 }
 0x400   :  { %p2616_p7 = scmp.ne.s32.totalorder %s3662_s11, %s2615_s8  ;;  %p2619_p8 = scmp.lt.u32.totalorder %s2615_s8, %s3662_s11 }
 0x402   :  { %p2621_p9 = pnand %p2619_p8, %p2616_p7 }
 0x404   :  { %2624 = shalt.err (!%p2621_p9)
}
 0x405   :  { %1994 = dma.vmem_to_hbm [thread:$0]  %s1989_s19, 4096, %s3662_s11, [#allocation6], %s2632_s3, %s2632_s3, %s2633_s27  }
 0x406   :  { %2625 = dma.done.wait [#allocation4], 256  }
 0x407   :  { %2626 = vsyncadd [#allocation4], 4294967040 }
 0x408   :  { %2627 = dma.done.wait [#allocation6], 4608  }
 0x409   :  { %2628 = vsyncadd [#allocation6], 4294962688 }
 0x40a   :  { %2004 = vsyncpa [#allocation4], 1 }
 0x40b   :  { %2005 = vsyncpa [#allocation6], 1 }

</bundles_post_ra>
